<compile_context>
chip_gen: v7x
topology: tpu7x:2x2x1
jax: 0.10.0
libtpu: 0.0.40
codegen_flags: <defaults>
</compile_context>

<pallas_src>
import numpy as np
import jax
import jax.numpy as jnp
from jax import lax
from jax.experimental import pallas as pl
from jax.experimental.pallas import tpu as pltpu

_HIGHEST = jax.lax.Precision.HIGHEST


# ----------------------------- fused kernel --------------------------------

def _fused_net_kernel(x_ref, w256_ref, w128_ref, o_ref, p1cat_ref):
  """One forward pass for a block of 8 images.

  x_ref    : (192, 144) im2col'd input; row = q*96 + rr*48 + m*8 + n holds
             input row (4m + 2q + rr + d) of image n at lanes d*28 + j.
  w256_ref : (880, 256) [T1 (144) | T2 (640) | Wfc1a (48) | Wfc1b (48)]
  w128_ref : (296, 128) [Wfc2 (128) | Wout (128) | biases (5 x 8-row slots)]
  o_ref    : (8, 128)   logits (10 real lanes) for the 8 images.
  p1cat_ref: (32, 768)  VMEM scratch: pooled conv1 activations replicated into
             six 128-lane blocks so conv2's 5 row-taps are K-merged.
  """
  f32 = jnp.float32

  # ---- conv1 (5x5, 1->6) + ReLU + 2x2 maxpool: one dot per pool row-parity.
  t1 = w256_ref[0:144, :]                         # width-Toeplitz, K = 5*28(+pad)
  b1 = w128_ref[256:257, :]
  for q in range(2):
    r = jnp.dot(x_ref[q * 96:(q + 1) * 96, :], t1,
                preferred_element_type=f32)       # (96, 256)
    m = jnp.maximum(jnp.maximum(r[0:48, 0:128], r[0:48, 128:256]),
                    jnp.maximum(r[48:96, 0:128], r[48:96, 128:256]))
    p1 = jnp.maximum(m + b1, 0.0)                 # (48, 128); lanes 72..127 == 0
    # scatter this parity's 3 row-groups into the conv2 K-slab (aligned stores)
    for s in range(3):
      o2 = 2 * s + q
      p1cat_ref[:, o2 * 128:(o2 + 1) * 128] = p1[s * 8:s * 8 + 32, :]

  # ---- conv2 (5x5, 6->12) + ReLU + 2x2 maxpool: 2 dots with K = 5*128.
  t2 = w256_ref[144:784, :]                       # (640, 256)
  b2 = w128_ref[264:265, :]
  a0 = jnp.dot(p1cat_ref[:, 0:640], t2, preferred_element_type=f32)    # (32,256)
  a1 = jnp.dot(p1cat_ref[:, 128:768], t2, preferred_element_type=f32)  # (32,256)
  m = jnp.maximum(a0, a1)                         # pool over row parity
  m = jnp.maximum(m[:, 0:128], m[:, 128:256])     # pool over width parity
  p2 = jnp.maximum(m + b2, 0.0)[:, 0:48]          # (32, 48), rows = ri*8 + n

  # ---- fc1 (block-diagonal trick; PyTorch flatten order folded into weights)
  bf1 = w128_ref[272:273, :]
  ha = jnp.dot(p2, w256_ref[784:832, :], preferred_element_type=f32)   # (32,256)
  hb = jnp.dot(p2, w256_ref[832:880, :], preferred_element_type=f32)   # (32,256)
  h = (ha[0:8, 0:128] + ha[8:16, 128:256] +
       hb[16:24, 0:128] + hb[24:32, 128:256])
  h = jnp.maximum(h + bf1, 0.0)                   # (8, 128)

  # ---- fc2 -> relu -> out
  bf2 = w128_ref[280:281, :]
  bo = w128_ref[288:289, :]
  h = jnp.maximum(jnp.dot(h, w128_ref[0:128, :], preferred_element_type=f32)
                  + bf2, 0.0)
  y = jnp.dot(h, w128_ref[128:256, :], preferred_element_type=f32) + bo
  o_ref[...] = y.astype(o_ref.dtype)              # (8, 128) lane-dense store


# --------------------------- one-time weight prep ---------------------------

def init_params(key):
  """Deterministic synthetic parameters matching the PyTorch module shapes."""
  ks = jax.random.split(key, 10)
  def u(k, shape, fan_in):
    bound = 1.0 / jnp.sqrt(fan_in)
    return jax.random.uniform(k, shape, jnp.float32, -bound, bound)
  return {
      "conv1_w": u(ks[0], (6, 1, 5, 5), 1 * 25),
      "conv1_b": u(ks[1], (6,), 1 * 25),
      "conv2_w": u(ks[2], (12, 6, 5, 5), 6 * 25),
      "conv2_b": u(ks[3], (12,), 6 * 25),
      "fc1_w": u(ks[4], (120, 192), 192),
      "fc1_b": u(ks[5], (120,), 192),
      "fc2_w": u(ks[6], (60, 120), 120),
      "fc2_b": u(ks[7], (60,), 120),
      "out_w": u(ks[8], (10, 60), 60),
      "out_b": u(ks[9], (10,), 60),
  }


def prepare_params(p):
  """One-time transform of PyTorch-layout weights into the two packed kernel
  slabs (width-Toeplitz conv matrices with the pool parity folded into aligned
  128-lane column blocks; permuted / zero-padded FC weights; biases).
  Done on the host, outside the jitted forward; the slabs are reused across
  calls so only the input slab and (8,128) logits move per inference."""
  w1 = np.asarray(p["conv1_w"], np.float32)[:, 0]      # (6,5,5)    [ci, d, e]
  w2 = np.asarray(p["conv2_w"], np.float32)            # (12,6,5,5) [do, ci, d, e]
  fc1_w = np.asarray(p["fc1_w"], np.float32)           # (120, 192)
  fc2_w = np.asarray(p["fc2_w"], np.float32)           # (60, 120)
  out_w = np.asarray(p["out_w"], np.float32)           # (10, 60)

  # conv1: T1[d*28 + j, b*128 + ci*12 + pj] = w1[ci, d, j - 2*pj - b]
  j = np.arange(28)[:, None, None]
  b = np.arange(2)[None, :, None]
  pj = np.arange(12)[None, None, :]
  e = j - 2 * pj - b                                   # (28, 2, 12)
  valid = ((e >= 0) & (e < 5)).astype(np.float32)
  core = w1[:, :, np.clip(e, 0, 4)] * valid            # (6,5,28,2,12)
  t1 = np.zeros((5, 28, 2, 128), np.float32)
  t1[..., :72] = np.transpose(core, (1, 2, 3, 0, 4)).reshape(5, 28, 2, 72)
  t1 = np.pad(t1.reshape(140, 256), ((0, 4), (0, 0)))  # (144, 256)

  # conv2: T2[d*128 + ci*12 + pj, b2*128 + do*4 + rj] = w2[do, ci, d, pj-2rj-b2]
  pj = np.arange(12)[:, None, None]
  b2 = np.arange(2)[None, :, None]
  rj = np.arange(4)[None, None, :]
  e = pj - 2 * rj - b2                                 # (12, 2, 4)
  valid = ((e >= 0) & (e < 5)).astype(np.float32)
  core = w2[:, :, :, np.clip(e, 0, 4)] * valid         # (12,6,5,12,2,4)
  t2 = np.zeros((5, 128, 2, 128), np.float32)
  t2[:, :72, :, :48] = np.transpose(core, (2, 1, 3, 4, 0, 5)).reshape(5, 72, 2, 48)
  t2 = t2.reshape(640, 256)

  # fc1 block-diagonal: rows = conv2 output cols (do*4 + rj); column block ri
  # holds fc1 rows for PyTorch flatten index do*16 + ri*4 + rj (out padded 128).
  blk = np.transpose(fc1_w.reshape(120, 12, 4, 4), (1, 3, 2, 0))  # (do,rj,ri,f)
  wf1 = np.zeros((48, 4, 128), np.float32)
  wf1[:, :, :120] = blk.reshape(48, 4, 120)
  wf1a = wf1[:, 0:2].reshape(48, 256)
  wf1b = wf1[:, 2:4].reshape(48, 256)

  w256 = np.concatenate([t1, t2, wf1a, wf1b], axis=0)  # (880, 256)

  wf2 = np.zeros((128, 128), np.float32)
  wf2[:120, :60] = fc2_w.T
  wo = np.zeros((128, 128), np.float32)
  wo[:60, :10] = out_w.T
  biases = np.zeros((40, 128), np.float32)             # one bias row per 8-row slot
  biases[0, :72] = np.repeat(np.asarray(p["conv1_b"], np.float32), 12)
  biases[8, :48] = np.repeat(np.asarray(p["conv2_b"], np.float32), 4)
  biases[16, :120] = np.asarray(p["fc1_b"], np.float32)
  biases[24, :60] = np.asarray(p["fc2_b"], np.float32)
  biases[32, :10] = np.asarray(p["out_b"], np.float32)
  w128 = np.concatenate([wf2, wo, biases], axis=0)     # (296, 128)

  return {"w256": jnp.asarray(w256), "w128": jnp.asarray(w128)}


# ------------------------------- forward ------------------------------------

def _build_x(x_nchw, num_blocks):
  """(N,1,28,28) -> (num_blocks*192, 144) im2col'd conv1 operand.
  Row q*96 + rr*48 + m*8 + n holds input row (4m + 2q + rr + d) of image n at
  lanes d*28 + j (K padded 140 -> 144).  One gather + transpose + reshape."""
  n = x_nchw.shape[0]
  x = jnp.pad(x_nchw[:, 0].astype(jnp.float32),
              ((0, num_blocks * 8 - n), (0, 0), (0, 0)))
  x = x.reshape(num_blocks, 8, 28, 28)
  q = np.arange(2)[:, None, None, None]
  rr = np.arange(2)[None, :, None, None]
  m = np.arange(6)[None, None, :, None]
  d = np.arange(5)[None, None, None, :]
  row_idx = jnp.asarray(4 * m + 2 * q + rr + d)        # (2,2,6,5), values 0..27
  g = x[:, :, row_idx, :]                              # (G, 8, 2, 2, 6, 5, 28)
  g = jnp.transpose(g, (0, 2, 3, 4, 1, 5, 6))          # (G, q, rr, m, n, d, j)
  g = g.reshape(num_blocks * 192, 140)
  return jnp.pad(g, ((0, 0), (0, 4)))


@jax.jit
def network_forward(x_nchw, prep):
  """Forward pass equivalent to Network.forward.  x: (N, 1, 28, 28) f32."""
  n = x_nchw.shape[0]
  g_blocks = (n + 7) // 8
  xs = _build_x(x_nchw, g_blocks)
  grid_spec = pltpu.PrefetchScalarGridSpec(
      num_scalar_prefetch=0,
      grid=(g_blocks,),
      in_specs=[
          pl.BlockSpec((192, 144), lambda g: (g, 0)),   # per-block input slab
          pl.BlockSpec((880, 256), lambda g: (0, 0)),   # resident weight slab
          pl.BlockSpec((296, 128), lambda g: (0, 0)),   # resident weight slab
      ],
      out_specs=pl.BlockSpec((8, 128), lambda g: (g, 0)),
      scratch_shapes=[pltpu.VMEM((32, 768), jnp.float32)],
  )
  out = pl.pallas_call(
      _fused_net_kernel,
      out_shape=jax.ShapeDtypeStruct((g_blocks * 8, 128), jnp.float32),
      grid_spec=grid_spec,
      compiler_params=pltpu.CompilerParams(
          dimension_semantics=("parallel",)),
  )(xs, prep["w256"], prep["w128"])
  return out[:n, :10]


# ------------------------------ reference -----------------------------------

def reference_forward(x_nchw, params):
  """Pure-JAX (XLA, HIGHEST precision) reference of the same forward pass."""
  def conv(x, w, b):
    y = lax.conv_general_dilated(
        x, w, window_strides=(1, 1), padding="VALID",
        dimension_numbers=("NCHW", "OIHW", "NCHW"), precision=_HIGHEST)
    return jnp.maximum(y + b[None, :, None, None], 0.0)

  def pool(x):
    return lax.reduce_window(x, -jnp.inf, lax.max,
                             (1, 1, 2, 2), (1, 1, 2, 2), "VALID")

  t = pool(conv(x_nchw, params["conv1_w"], params["conv1_b"]))
  t = pool(conv(t, params["conv2_w"], params["conv2_b"]))
  t = t.reshape(t.shape[0], -1)
  t = jnp.maximum(jnp.dot(t, params["fc1_w"].T, precision=_HIGHEST)
                  + params["fc1_b"], 0.0)
  t = jnp.maximum(jnp.dot(t, params["fc2_w"].T, precision=_HIGHEST)
                  + params["fc2_b"], 0.0)
  return jnp.dot(t, params["out_w"].T, precision=_HIGHEST) + params["out_b"]


if __name__ == "__main__":
  key = jax.random.PRNGKey(0)
  kx1, kx2, kp = jax.random.split(key, 3)
  params = init_params(kp)
  prep = prepare_params(params)          # one-time weight repack (host side)

  # batch of 2 (single grid step)
  x1 = jax.random.normal(kx1, (2, 1, 28, 28), jnp.float32)
  out1 = jax.block_until_ready(network_forward(x1, prep))
  assert out1.shape == (2, 10), out1.shape
  ref1 = jax.block_until_ready(reference_forward(x1, params))
  assert jnp.allclose(out1, ref1, rtol=5e-3, atol=5e-3), (out1, ref1)

  # batch of 11 (two parallel grid steps, padded final block)
  x2 = jax.random.normal(kx2, (11, 1, 28, 28), jnp.float32)
  out2 = jax.block_until_ready(network_forward(x2, prep))
  assert out2.shape == (11, 10), out2.shape
  ref2 = jax.block_until_ready(reference_forward(x2, params))
  assert jnp.allclose(out2, ref2, rtol=5e-3, atol=5e-3), (out2, ref2)

  print("KERNEL_OK")
</pallas_src>

<mosaic_0001>
module attributes {stable_mosaic.version = 11 : i64} {
  func.func @_fused_net_kernel(%arg0: i32, %arg1: memref<192x144xf32, #tpu.memory_space<vmem>>, %arg2: memref<880x256xf32, #tpu.memory_space<vmem>>, %arg3: memref<296x128xf32, #tpu.memory_space<vmem>>, %arg4: memref<8x128xf32, #tpu.memory_space<vmem>>, %arg5: memref<32x768xf32, #tpu.memory_space<vmem>>) attributes {dimension_semantics = [#tpu.dimension_semantics<parallel>], iteration_bounds = array<i64: 1>, scalar_prefetch = 0 : i64, scratch_operands = 1 : i64, tpu.core_type = #tpu.core_type<tc>, window_params = [{transform_indices = @transform_0, window_bounds = array<i64: 192, 144>}, {pipeline_mode = #tpu.pipeline_mode<synchronous>, transform_indices = @transform_1, window_bounds = array<i64: 880, 256>}, {pipeline_mode = #tpu.pipeline_mode<synchronous>, transform_indices = @transform_2, window_bounds = array<i64: 296, 128>}, {transform_indices = @transform_3, window_bounds = array<i64: 8, 128>}]} {
    %c0 = arith.constant 0 : index
    %c0_0 = arith.constant 0 : index
    %0 = vector.load %arg2[%c0, %c0_0] : memref<880x256xf32, #tpu.memory_space<vmem>>, vector<144x256xf32>
    %c256 = arith.constant 256 : index
    %c0_1 = arith.constant 0 : index
    %1 = vector.load %arg3[%c256, %c0_1] : memref<296x128xf32, #tpu.memory_space<vmem>>, vector<1x128xf32>
    %c0_2 = arith.constant 0 : index
    %c0_3 = arith.constant 0 : index
    %2 = vector.load %arg1[%c0_2, %c0_3] : memref<192x144xf32, #tpu.memory_space<vmem>>, vector<96x144xf32>
    %cst = arith.constant dense<0.000000e+00> : vector<96x256xf32>
    %3 = tpu.matmul %2, %0, %cst {dimension_numbers = #tpu.dot_dimension_numbers<[1], [0], [0], [1], [0, 0, 1, 1], [], []>} : vector<96x144xf32>, vector<144x256xf32>, vector<96x256xf32> -> vector<96x256xf32>
    %4 = vector.extract_strided_slice %3 {offsets = [0, 0], sizes = [48, 128], strides = [1, 1]} : vector<96x256xf32> to vector<48x128xf32>
    %5 = vector.extract_strided_slice %3 {offsets = [0, 128], sizes = [48, 128], strides = [1, 1]} : vector<96x256xf32> to vector<48x128xf32>
    %6 = arith.maximumf %4, %5 : vector<48x128xf32>
    %7 = vector.extract_strided_slice %3 {offsets = [48, 0], sizes = [48, 128], strides = [1, 1]} : vector<96x256xf32> to vector<48x128xf32>
    %8 = vector.extract_strided_slice %3 {offsets = [48, 128], sizes = [48, 128], strides = [1, 1]} : vector<96x256xf32> to vector<48x128xf32>
    %9 = arith.maximumf %7, %8 : vector<48x128xf32>
    %10 = arith.maximumf %6, %9 : vector<48x128xf32>
    %11 = vector.broadcast %1 : vector<1x128xf32> to vector<48x128xf32>
    %12 = arith.addf %10, %11 : vector<48x128xf32>
    %cst_4 = arith.constant 0.000000e+00 : f32
    %13 = vector.broadcast %cst_4 : f32 to vector<48x128xf32>
    %14 = arith.maximumf %12, %13 : vector<48x128xf32>
    %15 = vector.extract_strided_slice %14 {offsets = [0, 0], sizes = [32, 128], strides = [1, 1]} : vector<48x128xf32> to vector<32x128xf32>
    %c0_5 = arith.constant 0 : index
    %c0_6 = arith.constant 0 : index
    %16 = vector.load %arg5[%c0_5, %c0_6] : memref<32x768xf32, #tpu.memory_space<vmem>>, vector<32x128xf32>
    tpu.vector_store %arg5[%c0_5, %c0_6], %15 {strides = array<i32>} : memref<32x768xf32, #tpu.memory_space<vmem>>, vector<32x128xf32>,
    %17 = vector.extract_strided_slice %14 {offsets = [8, 0], sizes = [32, 128], strides = [1, 1]} : vector<48x128xf32> to vector<32x128xf32>
    %c0_7 = arith.constant 0 : index
    %c256_8 = arith.constant 256 : index
    %18 = vector.load %arg5[%c0_7, %c256_8] : memref<32x768xf32, #tpu.memory_space<vmem>>, vector<32x128xf32>
    tpu.vector_store %arg5[%c0_7, %c256_8], %17 {strides = array<i32>} : memref<32x768xf32, #tpu.memory_space<vmem>>, vector<32x128xf32>,
    %19 = vector.extract_strided_slice %14 {offsets = [16, 0], sizes = [32, 128], strides = [1, 1]} : vector<48x128xf32> to vector<32x128xf32>
    %c0_9 = arith.constant 0 : index
    %c512 = arith.constant 512 : index
    %20 = vector.load %arg5[%c0_9, %c512] : memref<32x768xf32, #tpu.memory_space<vmem>>, vector<32x128xf32>
    tpu.vector_store %arg5[%c0_9, %c512], %19 {strides = array<i32>} : memref<32x768xf32, #tpu.memory_space<vmem>>, vector<32x128xf32>,
    %c96 = arith.constant 96 : index
    %c0_10 = arith.constant 0 : index
    %21 = vector.load %arg1[%c96, %c0_10] : memref<192x144xf32, #tpu.memory_space<vmem>>, vector<96x144xf32>
    %cst_11 = arith.constant dense<0.000000e+00> : vector<96x256xf32>
    %22 = tpu.matmul %21, %0, %cst_11 {dimension_numbers = #tpu.dot_dimension_numbers<[1], [0], [0], [1], [0, 0, 1, 1], [], []>} : vector<96x144xf32>, vector<144x256xf32>, vector<96x256xf32> -> vector<96x256xf32>
    %23 = vector.extract_strided_slice %22 {offsets = [0, 0], sizes = [48, 128], strides = [1, 1]} : vector<96x256xf32> to vector<48x128xf32>
    %24 = vector.extract_strided_slice %22 {offsets = [0, 128], sizes = [48, 128], strides = [1, 1]} : vector<96x256xf32> to vector<48x128xf32>
    %25 = arith.maximumf %23, %24 : vector<48x128xf32>
    %26 = vector.extract_strided_slice %22 {offsets = [48, 0], sizes = [48, 128], strides = [1, 1]} : vector<96x256xf32> to vector<48x128xf32>
    %27 = vector.extract_strided_slice %22 {offsets = [48, 128], sizes = [48, 128], strides = [1, 1]} : vector<96x256xf32> to vector<48x128xf32>
    %28 = arith.maximumf %26, %27 : vector<48x128xf32>
    %29 = arith.maximumf %25, %28 : vector<48x128xf32>
    %30 = vector.broadcast %1 : vector<1x128xf32> to vector<48x128xf32>
    %31 = arith.addf %29, %30 : vector<48x128xf32>
    %cst_12 = arith.constant 0.000000e+00 : f32
    %32 = vector.broadcast %cst_12 : f32 to vector<48x128xf32>
    %33 = arith.maximumf %31, %32 : vector<48x128xf32>
    %34 = vector.extract_strided_slice %33 {offsets = [0, 0], sizes = [32, 128], strides = [1, 1]} : vector<48x128xf32> to vector<32x128xf32>
    %c0_13 = arith.constant 0 : index
    %c128 = arith.constant 128 : index
    %35 = vector.load %arg5[%c0_13, %c128] : memref<32x768xf32, #tpu.memory_space<vmem>>, vector<32x128xf32>
    tpu.vector_store %arg5[%c0_13, %c128], %34 {strides = array<i32>} : memref<32x768xf32, #tpu.memory_space<vmem>>, vector<32x128xf32>,
    %36 = vector.extract_strided_slice %33 {offsets = [8, 0], sizes = [32, 128], strides = [1, 1]} : vector<48x128xf32> to vector<32x128xf32>
    %c0_14 = arith.constant 0 : index
    %c384 = arith.constant 384 : index
    %37 = vector.load %arg5[%c0_14, %c384] : memref<32x768xf32, #tpu.memory_space<vmem>>, vector<32x128xf32>
    tpu.vector_store %arg5[%c0_14, %c384], %36 {strides = array<i32>} : memref<32x768xf32, #tpu.memory_space<vmem>>, vector<32x128xf32>,
    %38 = vector.extract_strided_slice %33 {offsets = [16, 0], sizes = [32, 128], strides = [1, 1]} : vector<48x128xf32> to vector<32x128xf32>
    %c0_15 = arith.constant 0 : index
    %c640 = arith.constant 640 : index
    %39 = vector.load %arg5[%c0_15, %c640] : memref<32x768xf32, #tpu.memory_space<vmem>>, vector<32x128xf32>
    tpu.vector_store %arg5[%c0_15, %c640], %38 {strides = array<i32>} : memref<32x768xf32, #tpu.memory_space<vmem>>, vector<32x128xf32>,
    %c144 = arith.constant 144 : index
    %c0_16 = arith.constant 0 : index
    %40 = vector.load %arg2[%c144, %c0_16] : memref<880x256xf32, #tpu.memory_space<vmem>>, vector<640x256xf32>
    %c264 = arith.constant 264 : index
    %c0_17 = arith.constant 0 : index
    %41 = vector.load %arg3[%c264, %c0_17] : memref<296x128xf32, #tpu.memory_space<vmem>>, vector<1x128xf32>
    %c0_18 = arith.constant 0 : index
    %c0_19 = arith.constant 0 : index
    %42 = vector.load %arg5[%c0_18, %c0_19] : memref<32x768xf32, #tpu.memory_space<vmem>>, vector<32x640xf32>
    %cst_20 = arith.constant dense<0.000000e+00> : vector<32x256xf32>
    %43 = tpu.matmul %42, %40, %cst_20 {dimension_numbers = #tpu.dot_dimension_numbers<[1], [0], [0], [1], [0, 0, 1, 1], [], []>} : vector<32x640xf32>, vector<640x256xf32>, vector<32x256xf32> -> vector<32x256xf32>
    %c0_21 = arith.constant 0 : index
    %c128_22 = arith.constant 128 : index
    %44 = vector.load %arg5[%c0_21, %c128_22] : memref<32x768xf32, #tpu.memory_space<vmem>>, vector<32x640xf32>
    %cst_23 = arith.constant dense<0.000000e+00> : vector<32x256xf32>
    %45 = tpu.matmul %44, %40, %cst_23 {dimension_numbers = #tpu.dot_dimension_numbers<[1], [0], [0], [1], [0, 0, 1, 1], [], []>} : vector<32x640xf32>, vector<640x256xf32>, vector<32x256xf32> -> vector<32x256xf32>
    %46 = arith.maximumf %43, %45 : vector<32x256xf32>
    %47 = vector.extract_strided_slice %46 {offsets = [0, 0], sizes = [32, 128], strides = [1, 1]} : vector<32x256xf32> to vector<32x128xf32>
    %48 = vector.extract_strided_slice %46 {offsets = [0, 128], sizes = [32, 128], strides = [1, 1]} : vector<32x256xf32> to vector<32x128xf32>
    %49 = arith.maximumf %47, %48 : vector<32x128xf32>
    %50 = vector.broadcast %41 : vector<1x128xf32> to vector<32x128xf32>
    %51 = arith.addf %49, %50 : vector<32x128xf32>
    %cst_24 = arith.constant 0.000000e+00 : f32
    %52 = vector.broadcast %cst_24 : f32 to vector<32x128xf32>
    %53 = arith.maximumf %51, %52 : vector<32x128xf32>
    %54 = vector.extract_strided_slice %53 {offsets = [0, 0], sizes = [32, 48], strides = [1, 1]} : vector<32x128xf32> to vector<32x48xf32>
    %c272 = arith.constant 272 : index
    %c0_25 = arith.constant 0 : index
    %55 = vector.load %arg3[%c272, %c0_25] : memref<296x128xf32, #tpu.memory_space<vmem>>, vector<1x128xf32>
    %c784 = arith.constant 784 : index
    %c0_26 = arith.constant 0 : index
    %56 = vector.load %arg2[%c784, %c0_26] : memref<880x256xf32, #tpu.memory_space<vmem>>, vector<48x256xf32>
    %cst_27 = arith.constant dense<0.000000e+00> : vector<32x256xf32>
    %57 = tpu.matmul %54, %56, %cst_27 {dimension_numbers = #tpu.dot_dimension_numbers<[1], [0], [0], [1], [0, 0, 1, 1], [], []>} : vector<32x48xf32>, vector<48x256xf32>, vector<32x256xf32> -> vector<32x256xf32>
    %c832 = arith.constant 832 : index
    %c0_28 = arith.constant 0 : index
    %58 = vector.load %arg2[%c832, %c0_28] : memref<880x256xf32, #tpu.memory_space<vmem>>, vector<48x256xf32>
    %cst_29 = arith.constant dense<0.000000e+00> : vector<32x256xf32>
    %59 = tpu.matmul %54, %58, %cst_29 {dimension_numbers = #tpu.dot_dimension_numbers<[1], [0], [0], [1], [0, 0, 1, 1], [], []>} : vector<32x48xf32>, vector<48x256xf32>, vector<32x256xf32> -> vector<32x256xf32>
    %60 = vector.extract_strided_slice %57 {offsets = [0, 0], sizes = [8, 128], strides = [1, 1]} : vector<32x256xf32> to vector<8x128xf32>
    %61 = vector.extract_strided_slice %57 {offsets = [8, 128], sizes = [8, 128], strides = [1, 1]} : vector<32x256xf32> to vector<8x128xf32>
    %62 = arith.addf %60, %61 : vector<8x128xf32>
    %63 = vector.extract_strided_slice %59 {offsets = [16, 0], sizes = [8, 128], strides = [1, 1]} : vector<32x256xf32> to vector<8x128xf32>
    %64 = arith.addf %62, %63 : vector<8x128xf32>
    %65 = vector.extract_strided_slice %59 {offsets = [24, 128], sizes = [8, 128], strides = [1, 1]} : vector<32x256xf32> to vector<8x128xf32>
    %66 = arith.addf %64, %65 : vector<8x128xf32>
    %67 = vector.broadcast %55 : vector<1x128xf32> to vector<8x128xf32>
    %68 = arith.addf %66, %67 : vector<8x128xf32>
    %cst_30 = arith.constant 0.000000e+00 : f32
    %69 = vector.broadcast %cst_30 : f32 to vector<8x128xf32>
    %70 = arith.maximumf %68, %69 : vector<8x128xf32>
    %c280 = arith.constant 280 : index
    %c0_31 = arith.constant 0 : index
    %71 = vector.load %arg3[%c280, %c0_31] : memref<296x128xf32, #tpu.memory_space<vmem>>, vector<1x128xf32>
    %c288 = arith.constant 288 : index
    %c0_32 = arith.constant 0 : index
    %72 = vector.load %arg3[%c288, %c0_32] : memref<296x128xf32, #tpu.memory_space<vmem>>, vector<1x128xf32>
    %c0_33 = arith.constant 0 : index
    %c0_34 = arith.constant 0 : index
    %73 = vector.load %arg3[%c0_33, %c0_34] : memref<296x128xf32, #tpu.memory_space<vmem>>, vector<128x128xf32>
    %cst_35 = arith.constant dense<0.000000e+00> : vector<8x128xf32>
    %74 = tpu.matmul %70, %73, %cst_35 {dimension_numbers = #tpu.dot_dimension_numbers<[1], [0], [0], [1], [0, 0, 1, 1], [], []>} : vector<8x128xf32>, vector<128x128xf32>, vector<8x128xf32> -> vector<8x128xf32>
    %75 = vector.broadcast %71 : vector<1x128xf32> to vector<8x128xf32>
    %76 = arith.addf %74, %75 : vector<8x128xf32>
    %cst_36 = arith.constant 0.000000e+00 : f32
    %77 = vector.broadcast %cst_36 : f32 to vector<8x128xf32>
    %78 = arith.maximumf %76, %77 : vector<8x128xf32>
    %c128_37 = arith.constant 128 : index
    %c0_38 = arith.constant 0 : index
    %79 = vector.load %arg3[%c128_37, %c0_38] : memref<296x128xf32, #tpu.memory_space<vmem>>, vector<128x128xf32>
    %cst_39 = arith.constant dense<0.000000e+00> : vector<8x128xf32>
    %80 = tpu.matmul %78, %79, %cst_39 {dimension_numbers = #tpu.dot_dimension_numbers<[1], [0], [0], [1], [0, 0, 1, 1], [], []>} : vector<8x128xf32>, vector<128x128xf32>, vector<8x128xf32> -> vector<8x128xf32>
    %81 = vector.broadcast %72 : vector<1x128xf32> to vector<8x128xf32>
    %82 = arith.addf %80, %81 : vector<8x128xf32>
    %c0_40 = arith.constant 0 : index
    %c0_41 = arith.constant 0 : index
    %83 = vector.load %arg4[%c0_40, %c0_41] : memref<8x128xf32, #tpu.memory_space<vmem>>, vector<8x128xf32>
    tpu.vector_store %arg4[%c0_40, %c0_41], %82 {strides = array<i32>} : memref<8x128xf32, #tpu.memory_space<vmem>>, vector<8x128xf32>,
    return
  }
  func.func @transform_0(%arg0: i32) -> (i32, i32) {
    %c0_i32 = arith.constant 0 : i32
    %c0_i32_0 = arith.constant 0 : i32
    return %arg0, %c0_i32 : i32, i32
  }
  func.func @transform_1(%arg0: i32) -> (i32, i32) {
    %c0_i32 = arith.constant 0 : i32
    %c0_i32_0 = arith.constant 0 : i32
    %c0_i32_1 = arith.constant 0 : i32
    return %c0_i32, %c0_i32_0 : i32, i32
  }
  func.func @transform_2(%arg0: i32) -> (i32, i32) {
    %c0_i32 = arith.constant 0 : i32
    %c0_i32_0 = arith.constant 0 : i32
    %c0_i32_1 = arith.constant 0 : i32
    return %c0_i32, %c0_i32_0 : i32, i32
  }
  func.func @transform_3(%arg0: i32) -> (i32, i32) {
    %c0_i32 = arith.constant 0 : i32
    %c0_i32_0 = arith.constant 0 : i32
    return %arg0, %c0_i32 : i32, i32
  }
}

</mosaic_0001>

<bundles_post_ra>
// kernel: network_forward.1
= control target key start
LH: loop header
LB: loop body
LE: loop exit
PB: predicated region body
PF: predicated region fallthrough
CT: control target
= control target key end

     0   :  { %vm75_vm0 = vcmask 130048   ;;  %vm1306_vm1 = vcmask 392192   ;;  %vm2336_vm2 = vmmov 0   ;;  %s3490_s1 = inlined_call_operand.vmem [shape: f32[880,256], index: 1, kind: input, shape index: {}]   ;;  %s3491_s0 = inlined_call_operand.vmem [shape: f32[192,144], index: 0, kind: input, shape index: {}]   ;;  %s3492_s2 = inlined_call_operand.vmem [shape: f32[296,128], index: 2, kind: input, shape index: {}]   ;;  %s3493_s3 = inlined_call_operand.vmem [shape: f32[8,128], index: 3, kind: output, shape index: {}]  }
   0x1   :  { %v15_v0 = vld [vmem:[%s3490_s1 + $0x8] sm:$0xff]  ;;  %v17_v1 = vld [vmem:[%s3490_s1 + $0x18] sm:$0xff]  ;;  %v14_v2 = vld [vmem:[%s3490_s1] sm:$0xff] }
   0x2   :  { %v1835_v3 = vpack.c.bf16 %v17_v1, %v15_v0  ;;  %v16_v4 = vld [vmem:[%s3490_s1 + $0x10] sm:$0xff]  ;;  %v19_v5 = vld [vmem:[%s3490_s1 + $0x28] sm:$0xff]  ;;  %v21_v6 = vld [vmem:[%s3490_s1 + $0x38] sm:$0xff] }
   0x3   :  { %v1837_v7 = vpack.c.bf16 %v16_v4, %v14_v2  ;;  %v1839_v8 = vpack.c.bf16 %v21_v6, %v19_v5  ;;  %v18_v9 = vld [vmem:[%s3490_s1 + $0x20] sm:$0xff]  ;;  %v20_v10 = vld [vmem:[%s3490_s1 + $0x30] sm:$0xff]  ;;  %v23_v11 = vld [vmem:[%s3490_s1 + $0x48] sm:$0xff] }
   0x4   :  { %1836 = vmatprep.subr.bf16.mxu0 %v1835_v3  ;;  %1872 = vmatprep.subr.bf16.mxu1 %v1835_v3  ;;  %v25_v12 = vld [vmem:[%s3490_s1 + $0x58] sm:$0xff]  ;;  %v1841_v13 = vpack.c.bf16 %v20_v10, %v18_v9  ;;  %v22_v15 = vld [vmem:[%s3490_s1 + $0x40] sm:$0xff]  ;;  %v24_v16 = vld [vmem:[%s3490_s1 + $0x50] sm:$0xff] }
   0x5   :  { %1838 = vmatpush1.bf16.msra.mxu0 %v1837_v7  ;;  %1874 = vmatpush1.bf16.msra.mxu1 %v1837_v7  ;;  %v1843_v14 = vpack.c.bf16 %v25_v12, %v23_v11  ;;  %v27_v17 = vld [vmem:[%s3490_s1 + $0x68] sm:$0xff]  ;;  %v29_v18 = vld [vmem:[%s3490_s1 + $0x78] sm:$0xff]  ;;  %v1845_v19 = vpack.c.bf16 %v24_v16, %v22_v15  ;;  %v26_v21 = vld [vmem:[%s3490_s1 + $0x60] sm:$0xff] }
   0x6   :  { %1840 = vmatprep.subr.bf16.mxu0 %v1839_v8  ;;  %1876 = vmatprep.subr.bf16.mxu1 %v1839_v8  ;;  %v1847_v20 = vpack.c.bf16 %v29_v18, %v27_v17  ;;  %v28_v22 = vld [vmem:[%s3490_s1 + $0x70] sm:$0xff]  ;;  %v31_v23 = vld [vmem:[%s3490_s1 + $0x88] sm:$0xff]  ;;  %v33_v24 = vld [vmem:[%s3490_s1 + $0x98] sm:$0xff] }
   0x7   :  { %v1849_v25 = vpack.c.bf16 %v28_v22, %v26_v21  ;;  %v52_v26 = vld [vmem:[%s3491_s0 + $0x8] sm:$0xff]  ;;  %v1851_v28 = vpack.c.bf16 %v33_v24, %v31_v23  ;;  %v30_v29 = vld [vmem:[%s3490_s1 + $0x80] sm:$0xff]  ;;  %v32_v30 = vld [vmem:[%s3490_s1 + $0x90] sm:$0xff] }
   0x8   :  { %v296_v27 = vld [vmem:[%s3491_s0 + $0xc8] sm:$0xff]  ;;  %v37_v32 = vld [vmem:[%s3490_s1 + $0xb8] sm:$0xff]  ;;  %1694 = vmatprep.mubr.msk.f32.mxu0 %vm75_vm0, %v52_v26  ;;  %v1853_v33 = vpack.c.bf16 %v32_v30, %v30_v29  ;;  %v34_v35 = vld [vmem:[%s3490_s1 + $0xa0] sm:$0xff] }
   0x9   :  { %1842 = vmatpush1.bf16.msra.mxu0 %v1841_v13  ;;  %1878 = vmatpush1.bf16.msra.mxu1 %v1841_v13  ;;  %v35_v31 = vld [vmem:[%s3490_s1 + $0xa8] sm:$0xff]  ;;  %v36_v36 = vld [vmem:[%s3490_s1 + $0xb0] sm:$0xff]  ;;  %v41_v38 = vld [vmem:[%s3490_s1 + $0xd8] sm:$0xff] }
   0xa   :  { %1844 = vmatprep.subr.bf16.mxu0 %v1843_v14  ;;  %1880 = vmatprep.subr.bf16.mxu1 %v1843_v14  ;;  %v1855_v34 = vpack.c.bf16 %v37_v32, %v35_v31  ;;  %v39_v37 = vld [vmem:[%s3490_s1 + $0xc8] sm:$0xff]  ;;  %v1857_v39 = vpack.c.bf16 %v36_v36, %v34_v35  ;;  %v38_v41 = vld [vmem:[%s3490_s1 + $0xc0] sm:$0xff]  ;;  %v40_v42 = vld [vmem:[%s3490_s1 + $0xd0] sm:$0xff] }
   0xb   :  { %1707 = vmatprep.mubr.msk.f32.mxu1 %vm75_vm0, %v296_v27  ;;  %v1859_v40 = vpack.c.bf16 %v41_v38, %v39_v37  ;;  %v43_v43 = vld [vmem:[%s3490_s1 + $0xe8] sm:$0xff]  ;;  %v45_v44 = vld [vmem:[%s3490_s1 + $0xf8] sm:$0xff]  ;;  %v1861_v45 = vpack.c.bf16 %v40_v42, %v38_v41  ;;  %v42_v47 = vld [vmem:[%s3490_s1 + $0xe0] sm:$0xff] }
   0xc   :  { %v1863_v46 = vpack.c.bf16 %v45_v44, %v43_v43  ;;  %v44_v48 = vld [vmem:[%s3490_s1 + $0xf0] sm:$0xff]  ;;  %v47_v49 = vld [vmem:[%s3490_s1 + $0x108] sm:$0xff]  ;;  %v49_v50 = vld [vmem:[%s3490_s1 + $0x118] sm:$0xff] }
   0xd   :  { %1846 = vmatpush1.bf16.msra.mxu0 %v1845_v19  ;;  %1882 = vmatpush1.bf16.msra.mxu1 %v1845_v19  ;;  %v1865_v51 = vpack.c.bf16 %v44_v48, %v42_v47  ;;  %v1867_v52 = vpack.c.bf16 %v49_v50, %v47_v49  ;;  %v46_v53 = vld [vmem:[%s3490_s1 + $0x100] sm:$0xff]  ;;  %v48_v54 = vld [vmem:[%s3490_s1 + $0x110] sm:$0xff]  ;;  %v535_v55 = vld [vmem:[%s3490_s1 + $0x128] sm:$0xff] }
   0xe   :  { %1848 = vmatprep.subr.bf16.mxu0 %v1847_v20  ;;  %1884 = vmatprep.subr.bf16.mxu1 %v1847_v20  ;;  %v537_v56 = vld [vmem:[%s3490_s1 + $0x138] sm:$0xff]  ;;  %v1869_v57 = vpack.c.bf16 %v48_v54, %v46_v53  ;;  %v534_v59 = vld [vmem:[%s3490_s1 + $0x120] sm:$0xff]  ;;  %v536_v60 = vld [vmem:[%s3490_s1 + $0x130] sm:$0xff] }
   0xf   :  { %v1907_v58 = vpack.c.bf16 %v537_v56, %v535_v55  ;;  %v539_v61 = vld [vmem:[%s3490_s1 + $0x148] sm:$0xff]  ;;  %v541_v62 = vld [vmem:[%s3490_s1 + $0x158] sm:$0xff]  ;;  %v51_v63 = vld [vmem:[%s3491_s0] sm:$0xff]  ;;  %v1909_v3 = vpack.c.bf16 %v536_v60, %v534_v59 }
  0x10   :  { %v295_v0 = vld [vmem:[%s3491_s0 + $0xc0] sm:$0xff]  ;;  %v54_v1 = vld [vmem:[%s3491_s0 + $0x18] sm:$0xff]  ;;  %v1911_v4 = vpack.c.bf16 %v541_v62, %v539_v61  ;;  %v540_v6 = vld [vmem:[%s3490_s1 + $0x150] sm:$0xff] }
  0x11   :  { %1850 = vmatpush1.bf16.msra.mxu0 %v1849_v25  ;;  %1886 = vmatpush1.bf16.msra.mxu1 %v1849_v25  ;;  %v298_v2 = vld [vmem:[%s3491_s0 + $0xd8] sm:$0xff]  ;;  %v538_v5 = vld [vmem:[%s3490_s1 + $0x140] sm:$0xff]  ;;  %v543_v7 = vld [vmem:[%s3490_s1 + $0x168] sm:$0xff] }
  0x12   :  { %1852 = vmatprep.subr.bf16.mxu0 %v1851_v28  ;;  %1888 = vmatprep.subr.bf16.mxu1 %v1851_v28  ;;  %v545_v8 = vld [vmem:[%s3490_s1 + $0x178] sm:$0xff]  ;;  %v53_v9 = vld [vmem:[%s3491_s0 + $0x10] sm:$0xff]  ;;  %v56_v11 = vld [vmem:[%s3491_s0 + $0x28] sm:$0xff]  ;;  %v1913_v13 = vpack.c.bf16 %v540_v6, %v538_v5 }
  0x13   :  { %v297_v10 = vld [vmem:[%s3491_s0 + $0xd0] sm:$0xff]  ;;  %v300_v12 = vld [vmem:[%s3491_s0 + $0xe8] sm:$0xff]  ;;  %v1915_v14 = vpack.c.bf16 %v545_v8, %v543_v7  ;;  %v542_v15 = vld [vmem:[%s3490_s1 + $0x160] sm:$0xff] }
  0x14   :  { %v544_v16 = vld [vmem:[%s3490_s1 + $0x170] sm:$0xff]  ;;  %v547_v17 = vld [vmem:[%s3490_s1 + $0x188] sm:$0xff]  ;;  %v549_v18 = vld [vmem:[%s3490_s1 + $0x198] sm:$0xff] }
  0x15   :  { %1854 = vmatpush1.bf16.msra.mxu0 %v1853_v33  ;;  %1890 = vmatpush1.bf16.msra.mxu1 %v1853_v33  ;;  %v55_v19 = vld [vmem:[%s3491_s0 + $0x20] sm:$0xff]  ;;  %v58_v21 = vld [vmem:[%s3491_s0 + $0x38] sm:$0xff]  ;;  %v1917_v23 = vpack.c.bf16 %v544_v16, %v542_v15  ;;  %v1919_v24 = vpack.c.bf16 %v549_v18, %v547_v17  ;;  %v548_v26 = vld [vmem:[%s3490_s1 + $0x190] sm:$0xff] }
  0x16   :  { %1856 = vmatprep.subr.bf16.mxu0 %v1855_v34  ;;  %1892 = vmatprep.subr.bf16.mxu1 %v1855_v34  ;;  %v299_v20 = vld [vmem:[%s3491_s0 + $0xe0] sm:$0xff]  ;;  %v302_v22 = vld [vmem:[%s3491_s0 + $0xf8] sm:$0xff]  ;;  %v551_v27 = vld [vmem:[%s3490_s1 + $0x1a8] sm:$0xff] }
  0x17   :  { %v546_v25 = vld [vmem:[%s3490_s1 + $0x180] sm:$0xff]  ;;  %v553_v28 = vld [vmem:[%s3490_s1 + $0x1b8] sm:$0xff]  ;;  %v57_v29 = vld [vmem:[%s3491_s0 + $0x30] sm:$0xff] }
  0x18   :  { %v301_v30 = vld [vmem:[%s3491_s0 + $0xf0] sm:$0xff]  ;;  %v60_v31 = vld [vmem:[%s3491_s0 + $0x48] sm:$0xff]  ;;  %v1921_v33 = vpack.c.bf16 %v548_v26, %v546_v25  ;;  %v1923_v34 = vpack.c.bf16 %v553_v28, %v551_v27  ;;  %v550_v35 = vld [vmem:[%s3490_s1 + $0x1a0] sm:$0xff] }
  0x19   :  { %1858 = vmatpush1.bf16.msra.mxu0 %v1857_v39  ;;  %1894 = vmatpush1.bf16.msra.mxu1 %v1857_v39  ;;  %v304_v32 = vld [vmem:[%s3491_s0 + $0x108] sm:$0xff]  ;;  %v552_v36 = vld [vmem:[%s3490_s1 + $0x1b0] sm:$0xff]  ;;  %v557_v38 = vld [vmem:[%s3490_s1 + $0x1d8] sm:$0xff] }
  0x1a   :  { %1860 = vmatprep.subr.bf16.mxu0 %v1859_v40  ;;  %1896 = vmatprep.subr.bf16.mxu1 %v1859_v40  ;;  %v555_v37 = vld [vmem:[%s3490_s1 + $0x1c8] sm:$0xff]  ;;  %v59_v39 = vld [vmem:[%s3491_s0 + $0x40] sm:$0xff]  ;;  %v62_v41 = vld [vmem:[%s3491_s0 + $0x58] sm:$0xff]  ;;  %v1925_v43 = vpack.c.bf16 %v552_v36, %v550_v35 }
  0x1b   :  { %v303_v40 = vld [vmem:[%s3491_s0 + $0x100] sm:$0xff]  ;;  %v306_v42 = vld [vmem:[%s3491_s0 + $0x118] sm:$0xff]  ;;  %v1927_v44 = vpack.c.bf16 %v557_v38, %v555_v37  ;;  %v559_v47 = vld [vmem:[%s3490_s1 + $0x1e8] sm:$0xff] }
  0x1c   :  { %v561_v48 = vld [vmem:[%s3490_s1 + $0x1f8] sm:$0xff]  ;;  %v61_v49 = vld [vmem:[%s3491_s0 + $0x50] sm:$0xff]  ;;  %v558_v55 = vld [vmem:[%s3490_s1 + $0x1e0] sm:$0xff] }
  0x1d   :  { %1862 = vmatpush1.bf16.msra.mxu0 %v1861_v45  ;;  %1898 = vmatpush1.bf16.msra.mxu1 %v1861_v45  ;;  %v554_v45 = vld [vmem:[%s3490_s1 + $0x1c0] sm:$0xff]  ;;  %v305_v50 = vld [vmem:[%s3491_s0 + $0x110] sm:$0xff]  ;;  %v1931_v54 = vpack.c.bf16 %v561_v48, %v559_v47  ;;  %v66_v61 = vld [vmem:[%s3491_s0 + $0x78] sm:$0xff] }
  0x1e   :  { %1864 = vmatprep.subr.bf16.mxu0 %v1863_v46  ;;  %1900 = vmatprep.subr.bf16.mxu1 %v1863_v46  ;;  %v556_v46 = vld [vmem:[%s3490_s1 + $0x1d0] sm:$0xff]  ;;  %v63_v59 = vld [vmem:[%s3491_s0 + $0x60] sm:$0xff]  ;;  %v310_v62 = vld [vmem:[%s3491_s0 + $0x138] sm:$0xff] }
  0x1f   :  { %v1929_v53 = vpack.c.bf16 %v556_v46, %v554_v45  ;;  %v560_v56 = vld [vmem:[%s3490_s1 + $0x1f0] sm:$0xff]  ;;  %v307_v60 = vld [vmem:[%s3491_s0 + $0x120] sm:$0xff]  ;;  %v68_v5 = vld [vmem:[%s3491_s0 + $0x88] sm:$0xff] }
  0x20   :  { %v312_v6 = vld [vmem:[%s3491_s0 + $0x148] sm:$0xff]  ;;  %v67_v8 = vld [vmem:[%s3491_s0 + $0x80] sm:$0xff]  ;;  %v74_v18 = vld [vmem:[%s3491_s0 + $0xb8] sm:$0xff] }
  0x21   :  { %1866 = vmatpush1.bf16.msra.mxu0 %v1865_v51  ;;  %1902 = vmatpush1.bf16.msra.mxu1 %v1865_v51  ;;  %v64_v51 = vld [vmem:[%s3491_s0 + $0x68] sm:$0xff]  ;;  %v71_v16 = vld [vmem:[%s3491_s0 + $0xa0] sm:$0xff]  ;;  %v568_v26 = vld [vmem:[%s3490_s1 + $0x230] sm:$0xff] }
  0x22   :  { %1868 = vmatprep.subr.bf16.mxu0 %v1867_v52  ;;  %1904 = vmatprep.subr.bf16.mxu1 %v1867_v52  ;;  %v308_v52 = vld [vmem:[%s3491_s0 + $0x128] sm:$0xff]  ;;  %v315_v17 = vld [vmem:[%s3491_s0 + $0x160] sm:$0xff]  ;;  %v577_v35 = vld [vmem:[%s3490_s1 + $0x278] sm:$0xff] }
  0x23   :  { %v316_v15 = vld [vmem:[%s3491_s0 + $0x168] sm:$0xff]  ;;  %v566_v25 = vld [vmem:[%s3490_s1 + $0x220] sm:$0xff]  ;;  %v576_v38 = vld [vmem:[%s3490_s1 + $0x270] sm:$0xff] }
  0x24   :  { %v1941_v27 = vpack.c.bf16 %v568_v26, %v566_v25  ;;  %v571_v28 = vld [vmem:[%s3490_s1 + $0x248] sm:$0xff]  ;;  %v574_v37 = vld [vmem:[%s3490_s1 + $0x260] sm:$0xff]  ;;  %v585_v47 = vld [vmem:[%s3490_s1 + $0x2b8] sm:$0xff] }
  0x25   :  { %1870 = vmatpush1.bf16.msra.mxu0 %v1869_v57  ;;  %1906 = vmatpush1.bf16.msra.mxu1 %v1869_v57  ;;  %v563_v57 = vld [vmem:[%s3490_s1 + $0x208] sm:$0xff] }
  0x26   :  { %1908 = vmatprep.subr.bf16.mxu0 %v1907_v58  ;;  %2068 = vmatprep.subr.bf16.mxu1 %v1907_v58  ;;  %v565_v58 = vld [vmem:[%s3490_s1 + $0x218] sm:$0xff]  ;;  %v583_v46 = vld [vmem:[%s3490_s1 + $0x2a8] sm:$0xff] }
  0x27   :  { %v1955_v48 = vpack.c.bf16 %v585_v47, %v583_v46 }
  0x28   :  { %177 = vmatmul.mubr.f32.vlgmr.msra.gmra.mrb[0].mxu0 %v51_v63  ;;  %420 = vmatmul.mubr.f32.vlgmr.msra.gmra.mrb[0].mxu1 %v295_v0  ;;  %v1933_v63 = vpack.c.bf16 %v560_v56, %v558_v55  ;;  %v1935_v0 = vpack.c.bf16 %v565_v58, %v563_v57  ;;  %v586_v55 = vld [vmem:[%s3490_s1 + $0x2c0] sm:$0xff]  ;;  %v588_v56 = vld [vmem:[%s3490_s1 + $0x2d0] sm:$0xff]  ;;  %v591_v58 = vld [vmem:[%s3490_s1 + $0x2e8] sm:$0xff] }
  0x29   :  { %1695 = vmatprep.mubr.msk.f32.mxu0 %vm75_vm0, %v54_v1  ;;  %1708 = vmatprep.mubr.msk.f32.mxu1 %vm75_vm0, %v298_v2  ;;  %v562_v1 = vld [vmem:[%s3490_s1 + $0x200] sm:$0xff]  ;;  %v564_v2 = vld [vmem:[%s3490_s1 + $0x210] sm:$0xff]  ;;  %v1961_v57 = vpack.c.bf16 %v588_v56, %v586_v55 }
  0x2a   :  { %1910 = vmatpush1.bf16.msra.mxu0 %v1909_v3  ;;  %2070 = vmatpush1.bf16.msra.mxu1 %v1909_v3  ;;  %v65_v3 = vld [vmem:[%s3491_s0 + $0x70] sm:$0xff]  ;;  %v1937_v7 = vpack.c.bf16 %v564_v2, %v562_v1  ;;  %v597_v1 = vld [vmem:[%s3490_s1 + $0x318] sm:$0xff]  ;;  %v598_v56 = vld [vmem:[%s3490_s1 + $0x320] sm:$0xff] }
  0x2b   :  { %1912 = vmatprep.subr.bf16.mxu0 %v1911_v4  ;;  %2072 = vmatprep.subr.bf16.mxu1 %v1911_v4  ;;  %v309_v4 = vld [vmem:[%s3491_s0 + $0x130] sm:$0xff] }
  0x2c   :  { %183 = vmatmul.mubr.f32.gmra.mrb[2].mxu0 %v53_v9  ;;  %426 = vmatmul.mubr.f32.gmra.mrb[2].mxu1 %v297_v10  ;;  %v311_v9 = vld [vmem:[%s3491_s0 + $0x140] sm:$0xff]  ;;  %v70_v10 = vld [vmem:[%s3491_s0 + $0x98] sm:$0xff] }
  0x2d   :  { %1696 = vmatprep.mubr.msk.f32.mxu0 %vm75_vm0, %v56_v11  ;;  %1709 = vmatprep.mubr.msk.f32.mxu1 %vm75_vm0, %v300_v12  ;;  %v314_v11 = vld [vmem:[%s3491_s0 + $0x158] sm:$0xff]  ;;  %v69_v12 = vld [vmem:[%s3491_s0 + $0x90] sm:$0xff] }
  0x2e   :  { %1914 = vmatpush1.bf16.msra.mxu0 %v1913_v13  ;;  %2074 = vmatpush1.bf16.msra.mxu1 %v1913_v13  ;;  %v313_v13 = vld [vmem:[%s3491_s0 + $0x150] sm:$0xff] }
  0x2f   :  { %1916 = vmatprep.subr.bf16.mxu0 %v1915_v14  ;;  %2076 = vmatprep.subr.bf16.mxu1 %v1915_v14  ;;  %v72_v14 = vld [vmem:[%s3491_s0 + $0xa8] sm:$0xff] }
  0x30   :  { %189 = vmatmul.mubr.f32.gmra.mrb[4].mxu0 %v55_v19  ;;  %432 = vmatmul.mubr.f32.gmra.mrb[4].mxu1 %v299_v20  ;;  %v318_v19 = vld [vmem:[%s3491_s0 + $0x178] sm:$0xff]  ;;  %v73_v20 = vld [vmem:[%s3491_s0 + $0xb0] sm:$0xff] }
  0x31   :  { %1697 = vmatprep.mubr.msk.f32.mxu0 %vm75_vm0, %v58_v21  ;;  %1710 = vmatprep.mubr.msk.f32.mxu1 %vm75_vm0, %v302_v22  ;;  %v317_v21 = vld [vmem:[%s3491_s0 + $0x170] sm:$0xff]  ;;  %v567_v22 = vld [vmem:[%s3490_s1 + $0x228] sm:$0xff] }
  0x32   :  { %1918 = vmatpush1.bf16.msra.mxu0 %v1917_v23  ;;  %2078 = vmatpush1.bf16.msra.mxu1 %v1917_v23  ;;  %v569_v23 = vld [vmem:[%s3490_s1 + $0x238] sm:$0xff] }
  0x33   :  { %1920 = vmatprep.subr.bf16.mxu0 %v1919_v24  ;;  %2080 = vmatprep.subr.bf16.mxu1 %v1919_v24  ;;  %v1939_v24 = vpack.c.bf16 %v569_v23, %v567_v22 }
  0x34   :  { %195 = vmatmul.mubr.f32.gmra.mrb[6].mxu0 %v57_v29  ;;  %438 = vmatmul.mubr.f32.gmra.mrb[6].mxu1 %v301_v30  ;;  %v573_v29 = vld [vmem:[%s3490_s1 + $0x258] sm:$0xff] }
  0x35   :  { %1698 = vmatprep.mubr.msk.f32.mxu0 %vm75_vm0, %v60_v31  ;;  %1711 = vmatprep.mubr.msk.f32.mxu1 %vm75_vm0, %v304_v32  ;;  %v1943_v30 = vpack.c.bf16 %v573_v29, %v571_v28  ;;  %v570_v31 = vld [vmem:[%s3490_s1 + $0x240] sm:$0xff]  ;;  %v572_v32 = vld [vmem:[%s3490_s1 + $0x250] sm:$0xff] }
  0x36   :  { %1922 = vmatpush1.bf16.msra.mxu0 %v1921_v33  ;;  %2082 = vmatpush1.bf16.msra.mxu1 %v1921_v33  ;;  %v1945_v33 = vpack.c.bf16 %v572_v32, %v570_v31 }
  0x37   :  { %1924 = vmatprep.subr.bf16.mxu0 %v1923_v34  ;;  %2084 = vmatprep.subr.bf16.mxu1 %v1923_v34  ;;  %v575_v34 = vld [vmem:[%s3490_s1 + $0x268] sm:$0xff] }
  0x38   :  { %201 = vmatmul.mubr.f32.gmra.mrb[8].mxu0 %v59_v39  ;;  %444 = vmatmul.mubr.f32.gmra.mrb[8].mxu1 %v303_v40  ;;  %v1947_v36 = vpack.c.bf16 %v577_v35, %v575_v34  ;;  %v1949_v39 = vpack.c.bf16 %v576_v38, %v574_v37  ;;  %v579_v40 = vld [vmem:[%s3490_s1 + $0x288] sm:$0xff] }
  0x39   :  { %1699 = vmatprep.mubr.msk.f32.mxu0 %vm75_vm0, %v62_v41  ;;  %1712 = vmatprep.mubr.msk.f32.mxu1 %vm75_vm0, %v306_v42  ;;  %v581_v41 = vld [vmem:[%s3490_s1 + $0x298] sm:$0xff] }
  0x3a   :  { %1926 = vmatpush1.bf16.msra.mxu0 %v1925_v43  ;;  %2086 = vmatpush1.bf16.msra.mxu1 %v1925_v43  ;;  %v1951_v42 = vpack.c.bf16 %v581_v41, %v579_v40  ;;  %v578_v43 = vld [vmem:[%s3490_s1 + $0x280] sm:$0xff] }
  0x3b   :  { %1928 = vmatprep.subr.bf16.mxu0 %v1927_v44  ;;  %2088 = vmatprep.subr.bf16.mxu1 %v1927_v44  ;;  %v580_v44 = vld [vmem:[%s3490_s1 + $0x290] sm:$0xff] }
  0x3c   :  { %207 = vmatmul.mubr.f32.gmra.mrb[10].mxu0 %v61_v49  ;;  %450 = vmatmul.mubr.f32.gmra.mrb[10].mxu1 %v305_v50  ;;  %v1953_v45 = vpack.c.bf16 %v580_v44, %v578_v43  ;;  %v582_v49 = vld [vmem:[%s3490_s1 + $0x2a0] sm:$0xff]  ;;  %v584_v50 = vld [vmem:[%s3490_s1 + $0x2b0] sm:$0xff] }
  0x3d   :  { %1700 = vmatprep.mubr.msk.f32.mxu0 %vm75_vm0, %v64_v51  ;;  %1713 = vmatprep.mubr.msk.f32.mxu1 %vm75_vm0, %v308_v52  ;;  %v1957_v51 = vpack.c.bf16 %v584_v50, %v582_v49  ;;  %v587_v52 = vld [vmem:[%s3490_s1 + $0x2c8] sm:$0xff] }
  0x3e   :  { %1930 = vmatpush1.bf16.msra.mxu0 %v1929_v53  ;;  %2090 = vmatpush1.bf16.msra.mxu1 %v1929_v53  ;;  %v589_v53 = vld [vmem:[%s3490_s1 + $0x2d8] sm:$0xff] }
  0x3f   :  { %1932 = vmatprep.subr.bf16.mxu0 %v1931_v54  ;;  %2092 = vmatprep.subr.bf16.mxu1 %v1931_v54  ;;  %v1959_v54 = vpack.c.bf16 %v589_v53, %v587_v52 }
  0x40   :  { %213 = vmatmul.mubr.f32.gmra.mrb[12].mxu0 %v63_v59  ;;  %456 = vmatmul.mubr.f32.gmra.mrb[12].mxu1 %v307_v60  ;;  %v593_v59 = vld [vmem:[%s3490_s1 + $0x2f8] sm:$0xff] }
  0x41   :  { %1701 = vmatprep.mubr.msk.f32.mxu0 %vm75_vm0, %v66_v61  ;;  %1714 = vmatprep.mubr.msk.f32.mxu1 %vm75_vm0, %v310_v62  ;;  %v1963_v60 = vpack.c.bf16 %v593_v59, %v591_v58  ;;  %v590_v61 = vld [vmem:[%s3490_s1 + $0x2e0] sm:$0xff]  ;;  %v592_v62 = vld [vmem:[%s3490_s1 + $0x2f0] sm:$0xff] }
  0x42   :  { %1934 = vmatpush1.bf16.msra.mxu0 %v1933_v63  ;;  %2094 = vmatpush1.bf16.msra.mxu1 %v1933_v63  ;;  %v1965_v63 = vpack.c.bf16 %v592_v62, %v590_v61 }
  0x43   :  { %1936 = vmatprep.subr.bf16.mxu0 %v1935_v0  ;;  %2096 = vmatprep.subr.bf16.mxu1 %v1935_v0  ;;  %v595_v0 = vld [vmem:[%s3490_s1 + $0x308] sm:$0xff] }
  0x44   :  { %219 = vmatmul.mubr.f32.gmra.mrb[14].mxu0 %v65_v3  ;;  %462 = vmatmul.mubr.f32.gmra.mrb[14].mxu1 %v309_v4  ;;  %v1967_v2 = vpack.c.bf16 %v597_v1, %v595_v0  ;;  %v594_v3 = vld [vmem:[%s3490_s1 + $0x300] sm:$0xff]  ;;  %v596_v4 = vld [vmem:[%s3490_s1 + $0x310] sm:$0xff]  ;;  %v603_v0 = vld [vmem:[%s3490_s1 + $0x348] sm:$0xff] }
  0x45   :  { %1702 = vmatprep.mubr.msk.f32.mxu0 %vm75_vm0, %v68_v5  ;;  %1715 = vmatprep.mubr.msk.f32.mxu1 %vm75_vm0, %v312_v6  ;;  %v1969_v5 = vpack.c.bf16 %v596_v4, %v594_v3  ;;  %v599_v6 = vld [vmem:[%s3490_s1 + $0x328] sm:$0xff]  ;;  %v605_v1 = vld [vmem:[%s3490_s1 + $0x358] sm:$0xff] }
  0x46   :  { %1938 = vmatpush1.bf16.msra.mxu0 %v1937_v7  ;;  %2098 = vmatpush1.bf16.msra.mxu1 %v1937_v7  ;;  %v601_v7 = vld [vmem:[%s3490_s1 + $0x338] sm:$0xff] }
  0x47   :  { %1940 = vmatprep.subr.bf16.mxu0 %v1939_v24  ;;  %2100 = vmatprep.subr.bf16.mxu1 %v1939_v24 }
  0x48   :  { %225 = vmatmul.mubr.f32.gmra.mrb[16].mxu0 %v67_v8  ;;  %468 = vmatmul.mubr.f32.gmra.mrb[16].mxu1 %v311_v9  ;;  %v1971_v8 = vpack.c.bf16 %v601_v7, %v599_v6 }
  0x49   :  { %1703 = vmatprep.mubr.msk.f32.mxu0 %vm75_vm0, %v70_v10  ;;  %1716 = vmatprep.mubr.msk.f32.mxu1 %vm75_vm0, %v314_v11 }
  0x4a   :  { %1942 = vmatpush1.bf16.msra.mxu0 %v1941_v27  ;;  %2102 = vmatpush1.bf16.msra.mxu1 %v1941_v27 }
  0x4b   :  { %1944 = vmatprep.subr.bf16.mxu0 %v1943_v30  ;;  %2104 = vmatprep.subr.bf16.mxu1 %v1943_v30 }
  0x4c   :  { %231 = vmatmul.mubr.f32.gmra.mrb[18].mxu0 %v69_v12  ;;  %474 = vmatmul.mubr.f32.gmra.mrb[18].mxu1 %v313_v13 }
  0x4d   :  { %1704 = vmatprep.mubr.msk.f32.mxu0 %vm75_vm0, %v72_v14  ;;  %1717 = vmatprep.mubr.msk.f32.mxu1 %vm75_vm0, %v316_v15 }
  0x4e   :  { %1946 = vmatpush1.bf16.msra.mxu0 %v1945_v33  ;;  %2106 = vmatpush1.bf16.msra.mxu1 %v1945_v33 }
  0x4f   :  { %1948 = vmatprep.subr.bf16.mxu0 %v1947_v36  ;;  %2108 = vmatprep.subr.bf16.mxu1 %v1947_v36 }
  0x50   :  { %237 = vmatmul.mubr.f32.gmra.mrb[20].mxu0 %v71_v16  ;;  %480 = vmatmul.mubr.f32.gmra.mrb[20].mxu1 %v315_v17 }
  0x51   :  { %1705 = vmatprep.mubr.msk.f32.mxu0 %vm75_vm0, %v74_v18  ;;  %1718 = vmatprep.mubr.msk.f32.mxu1 %vm75_vm0, %v318_v19 }
  0x52   :  { %1950 = vmatpush1.bf16.msra.mxu0 %v1949_v39  ;;  %2110 = vmatpush1.bf16.msra.mxu1 %v1949_v39 }
  0x53   :  { %1952 = vmatprep.subr.bf16.mxu0 %v1951_v42  ;;  %2112 = vmatprep.subr.bf16.mxu1 %v1951_v42 }
  0x54   :  { %243 = vmatmul.mubr.f32.gmra.mrb[22].mxu0 %v73_v20  ;;  %486 = vmatmul.mubr.f32.gmra.mrb[22].mxu1 %v317_v21 }
  0x56   :  { %1954 = vmatpush1.bf16.msra.mxu0 %v1953_v45  ;;  %2114 = vmatpush1.bf16.msra.mxu1 %v1953_v45 }
  0x57   :  { %1956 = vmatprep.subr.bf16.mxu0 %v1955_v48  ;;  %2116 = vmatprep.subr.bf16.mxu1 %v1955_v48 }
  0x5a   :  { %1958 = vmatpush1.bf16.msra.mxu0 %v1957_v51  ;;  %2118 = vmatpush1.bf16.msra.mxu1 %v1957_v51  ;;  %v2882_v51 = vld [vmem:[%s3492_s2 + $0x100] ss:$0 sm:$0xff] }
  0x5b   :  { %1960 = vmatprep.subr.bf16.mxu0 %v1959_v54  ;;  %2120 = vmatprep.subr.bf16.mxu1 %v1959_v54 }
  0x5e   :  { %1962 = vmatpush1.bf16.msra.mxu0 %v1961_v57  ;;  %2122 = vmatpush1.bf16.msra.mxu1 %v1961_v57  ;;  %v600_v57 = vld [vmem:[%s3490_s1 + $0x330] sm:$0xff] }
  0x5f   :  { %1964 = vmatprep.subr.bf16.mxu0 %v1963_v60  ;;  %2124 = vmatprep.subr.bf16.mxu1 %v1963_v60 }
  0x62   :  { %1966 = vmatpush1.bf16.msra.mxu0 %v1965_v63  ;;  %2126 = vmatpush1.bf16.msra.mxu1 %v1965_v63 }
  0x63   :  { %1968 = vmatprep.subr.bf16.mxu0 %v1967_v2  ;;  %2128 = vmatprep.subr.bf16.mxu1 %v1967_v2  ;;  %v1973_v2 = vpack.c.bf16 %v600_v57, %v598_v56  ;;  %v613_v56 = vld [vmem:[%s3490_s1 + $0x398] sm:$0xff] }
  0x66   :  { %1970 = vmatpush1.bf16.msra.mxu0 %v1969_v5  ;;  %2130 = vmatpush1.bf16.msra.mxu1 %v1969_v5 }
  0x67   :  { %1972 = vmatprep.subr.bf16.mxu0 %v1971_v8  ;;  %2132 = vmatprep.subr.bf16.mxu1 %v1971_v8 }
  0xfb   :  { %v178_v9 = vpop.f32.mrb[0].mxu0  ;;  %v421_v10 = vpop.f32.mrb[0].mxu1 }
  0xfc   :  { %v180_v11 = vpop.f32.mrb[1].mxu0  ;;  %v423_v12 = vpop.f32.mrb[1].mxu1 }
  0xfd   :  { %v249_v13 = vmax.f32 %v178_v9, %v180_v11  ;;  %v492_v14 = vmax.f32 %v421_v10, %v423_v12  ;;  %v602_v9 = vld [vmem:[%s3490_s1 + $0x340] sm:$0xff]  ;;  %v604_v10 = vld [vmem:[%s3490_s1 + $0x350] sm:$0xff] }
  0xff   :  { %v184_v15 = vpop.f32.mrb[2].mxu0  ;;  %v427_v16 = vpop.f32.mrb[2].mxu1 }
 0x100   :  { %v186_v17 = vpop.f32.mrb[3].mxu0  ;;  %v429_v18 = vpop.f32.mrb[3].mxu1 }
 0x101   :  { %v250_v19 = vmax.f32 %v184_v15, %v186_v17  ;;  %v493_v20 = vmax.f32 %v427_v16, %v429_v18  ;;  %v607_v18 = vld [vmem:[%s3490_s1 + $0x368] sm:$0xff] }
 0x103   :  { %v2831_v21 = vpop.f32.mrb[4].mxu0  ;;  %v2833_v22 = vpop.f32.mrb[4].mxu1 }
 0x104   :  { %v2835_v23 = vpop.f32.mrb[5].mxu0  ;;  %v2837_v24 = vpop.f32.mrb[5].mxu1 }
 0x105   :  { %v251_v25 = vmax.f32 %v2831_v21, %v2835_v23  ;;  %v494_v26 = vmax.f32 %v2833_v22, %v2837_v24  ;;  %v608_v24 = vld [vmem:[%s3490_s1 + $0x370] sm:$0xff] }
 0x107   :  { %v2843_v27 = vpop.f32.mrb[6].mxu0  ;;  %v2845_v28 = vpop.f32.mrb[6].mxu1 }
 0x108   :  { %v2847_v29 = vpop.f32.mrb[7].mxu0  ;;  %v2849_v30 = vpop.f32.mrb[7].mxu1 }
 0x109   :  { %v252_v31 = vmax.f32 %v2843_v27, %v2847_v29  ;;  %v495_v32 = vmax.f32 %v2845_v28, %v2849_v30 }
 0x10b   :  { %v2855_v33 = vpop.f32.mrb[8].mxu0  ;;  %v2857_v34 = vpop.f32.mrb[8].mxu1 }
 0x10c   :  { %v2859_v35 = vpop.f32.mrb[9].mxu0  ;;  %v2861_v36 = vpop.f32.mrb[9].mxu1 }
 0x10d   :  { %v253_v37 = vmax.f32 %v2855_v33, %v2859_v35  ;;  %v496_v38 = vmax.f32 %v2857_v34, %v2861_v36  ;;  %v614_v34 = vld [vmem:[%s3490_s1 + $0x3a0] sm:$0xff]  ;;  %v616_v36 = vld [vmem:[%s3490_s1 + $0x3b0] sm:$0xff] }
 0x10f   :  { %v2867_v39 = vpop.f32.mrb[10].mxu0  ;;  %v2869_v40 = vpop.f32.mrb[10].mxu1 }
 0x110   :  { %v2871_v41 = vpop.f32.mrb[11].mxu0  ;;  %v2873_v42 = vpop.f32.mrb[11].mxu1 }
 0x111   :  { %v254_v43 = vmax.f32 %v2867_v39, %v2871_v41  ;;  %v497_v44 = vmax.f32 %v2869_v40, %v2873_v42  ;;  %v618_v39 = vld [vmem:[%s3490_s1 + $0x3c0] sm:$0xff]  ;;  %v620_v40 = vld [vmem:[%s3490_s1 + $0x3d0] sm:$0xff] }
 0x113   :  { %v214_v45 = vpop.f32.mrb[12].mxu0  ;;  %v457_v46 = vpop.f32.mrb[12].mxu1 }
 0x114   :  { %v216_v47 = vpop.f32.mrb[13].mxu0  ;;  %v459_v48 = vpop.f32.mrb[13].mxu1 }
 0x115   :  { %v255_v49 = vmax.f32 %v214_v45, %v216_v47  ;;  %v498_v50 = vmax.f32 %v457_v46, %v459_v48 }
 0x117   :  { %v261_v52 = vmax.f32 %v249_v13, %v255_v49  ;;  %v504_v53 = vmax.f32 %v492_v14, %v498_v50  ;;  %v220_v54 = vpop.f32.mrb[14].mxu0  ;;  %v463_v55 = vpop.f32.mrb[14].mxu1  ;;  %v1975_v13 = vpack.c.bf16 %v605_v1, %v603_v0 }
 0x118   :  { %v222_v58 = vpop.f32.mrb[15].mxu0  ;;  %v465_v59 = vpop.f32.mrb[15].mxu1 }
 0x119   :  { %v271_v60 = vadd.f32 %v2882_v51, %v261_v52  ;;  %v256_v61 = vmax.f32 %v220_v54, %v222_v58  ;;  %v499_v62 = vmax.f32 %v463_v55, %v465_v59  ;;  %v510_v63 = vadd.f32 %v2882_v51, %v504_v53  ;;  %v606_v55 = vld [vmem:[%s3490_s1 + $0x360] sm:$0xff] }
 0x11a   :  { %v1981_v1 = vpack.c.bf16 %v608_v24, %v606_v55 }
 0x11b   :  { %v277_v3 = vmax.f32 %v271_v60, 0.0  ;;  %v262_v4 = vmax.f32 %v250_v19, %v256_v61  ;;  %v505_v5 = vmax.f32 %v493_v20, %v499_v62  ;;  %v226_v6 = vpop.f32.mrb[16].mxu0  ;;  %v469_v7 = vpop.f32.mrb[16].mxu1  ;;  %v516_v8 = vmax.f32 %v510_v63, 0.0  ;;  %v609_v19 = vld [vmem:[%s3490_s1 + $0x378] sm:$0xff] }
 0x11c   :  { %v228_v11 = vpop.f32.mrb[17].mxu0  ;;  %v471_v12 = vpop.f32.mrb[17].mxu1  ;;  %v1977_v20 = vpack.c.bf16 %v604_v10, %v602_v9  ;;  %v1979_v54 = vpack.c.bf16 %v609_v19, %v607_v18 }
 0x11d   :  { %v511_v14 = vadd.f32 %v2882_v51, %v505_v5  ;;  %v257_v15 = vmax.f32 %v226_v6, %v228_v11  ;;  %v500_v16 = vmax.f32 %v469_v7, %v471_v12  ;;  %779 = vmatprep.mubr.f32.mxu0 %v516_v8  ;;  %v272_v17 = vadd.f32 %v2882_v51, %v262_v4  ;;  %v610_v4 = vld [vmem:[%s3490_s1 + $0x380] sm:$0xff] }
 0x11e   :  { %780 = vmatmul.mubr.f32.vlgmr.msra.gmra.mrb[24].mxu0 %v277_v3 }
 0x11f   :  { %v2912_v45 = vmax.f32 %v511_v14, 0.0  ;;  %v263_v46 = vmax.f32 %v251_v25, %v257_v15  ;;  %v506_v47 = vmax.f32 %v494_v26, %v500_v16  ;;  %1974 = vmatpush1.bf16.msra.mxu0 %v1973_v2  ;;  %v232_v48 = vpop.f32.mrb[18].mxu0  ;;  %v475_v49 = vpop.f32.mrb[18].mxu1  ;;  %v2920_v50 = vmax.f32 %v272_v17, 0.0  ;;  %v611_v26 = vld [vmem:[%s3490_s1 + $0x388] sm:$0xff] }
 0x120   :  { %v234_v52 = vpop.f32.mrb[19].mxu0  ;;  %v477_v53 = vpop.f32.mrb[19].mxu1  ;;  %1976 = vmatprep.subr.bf16.mxu0 %v1975_v13  ;;  %v1983_v3 = vpack.c.bf16 %v613_v56, %v611_v26  ;;  %v630_v56 = vld [vmem:[%s3490_s1 + $0x420] sm:$0xff] }
 0x121   :  { %v273_v21 = vadd.f32 %v2882_v51, %v263_v46  ;;  %v512_v23 = vadd.f32 %v2882_v51, %v506_v47  ;;  %v258_v25 = vmax.f32 %v232_v48, %v234_v52  ;;  %v501_v22 = vmax.f32 %v475_v49, %v477_v53  ;;  %785 = vmatprep.mubr.f32.mxu0 %v2912_v45  ;;  %v622_v48 = vld [vmem:[%s3490_s1 + $0x3e0] sm:$0xff]  ;;  %v624_v49 = vld [vmem:[%s3490_s1 + $0x3f0] sm:$0xff]  ;;  %v627_v52 = vld [vmem:[%s3490_s1 + $0x408] sm:$0xff] }
 0x122   :  { %1066 = vmatprep.mubr.f32.mxu1 %v2920_v50  ;;  %786 = vmatmul.mubr.f32.gmra.mrb[26].mxu0 %v2920_v50  ;;  %v1993_v47 = vpack.c.bf16 %v620_v40, %v618_v39  ;;  %v629_v53 = vld [vmem:[%s3490_s1 + $0x418] sm:$0xff]  ;;  %v654_v39 = vld [vmem:[%s3490_s1 + $0x4e0] sm:$0xff]  ;;  %v656_v40 = vld [vmem:[%s3490_s1 + $0x4f0] sm:$0xff] }
 0x123   :  { %v2939_v57 = vmax.f32 %v273_v21, 0.0  ;;  %v2941_v58 = vmax.f32 %v512_v23, 0.0  ;;  %v264_v59 = vmax.f32 %v252_v31, %v258_v25  ;;  %v507_v60 = vmax.f32 %v495_v32, %v501_v22  ;;  %1978 = vmatpush1.bf16.msra.mxu0 %v1977_v20  ;;  %1067 = vmatmul.mubr.f32.vlgmr.msra.gmra.mrb[24].mxu1 %v516_v8  ;;  %v238_v61 = vpop.f32.mrb[20].mxu0  ;;  %v481_v62 = vpop.f32.mrb[20].mxu1  ;;  %v612_v31 = vld [vmem:[%s3490_s1 + $0x390] sm:$0xff]  ;;  %v615_v32 = vld [vmem:[%s3490_s1 + $0x3a8] sm:$0xff] }
 0x124   :  { %2134 = vmatpush1.bf16.msra.mxu1 %v1973_v2  ;;  %v240_v63 = vpop.f32.mrb[21].mxu0  ;;  %v483_v0 = vpop.f32.mrb[21].mxu1  ;;  %1980 = vmatprep.subr.bf16.mxu0 %v1979_v54  ;;  %v617_v2 = vld [vmem:[%s3490_s1 + $0x3b8] sm:$0xff]  ;;  %v1999_v55 = vpack.c.bf16 %v629_v53, %v627_v52  ;;  %v626_v21 = vld [vmem:[%s3490_s1 + $0x400] sm:$0xff]  ;;  %v628_v23 = vld [vmem:[%s3490_s1 + $0x410] sm:$0xff] }
 0x125   :  { %v274_v27 = vadd.f32 %v2882_v51, %v264_v59  ;;  %v513_v29 = vadd.f32 %v2882_v51, %v507_v60  ;;  %v259_v28 = vmax.f32 %v238_v61, %v240_v63  ;;  %v502_v30 = vmax.f32 %v481_v62, %v483_v0  ;;  %791 = vmatprep.mubr.f32.mxu0 %v2941_v58  ;;  %v631_v25 = vld [vmem:[%s3490_s1 + $0x428] sm:$0xff]  ;;  %v633_v22 = vld [vmem:[%s3490_s1 + $0x438] sm:$0xff]  ;;  %v632_v59 = vld [vmem:[%s3490_s1 + $0x430] sm:$0xff] }
 0x126   :  { %1072 = vmatprep.mubr.f32.mxu1 %v2939_v57  ;;  %2136 = vmatprep.subr.bf16.mxu1 %v1975_v13  ;;  %v1985_v13 = vpack.c.bf16 %v612_v31, %v610_v4  ;;  %v1987_v14 = vpack.c.bf16 %v617_v2, %v615_v32  ;;  %v2001_v24 = vpack.c.bf16 %v628_v23, %v626_v21  ;;  %v635_v60 = vld [vmem:[%s3490_s1 + $0x448] sm:$0xff]  ;;  %v637_v61 = vld [vmem:[%s3490_s1 + $0x458] sm:$0xff]  ;;  %v634_v0 = vld [vmem:[%s3490_s1 + $0x440] sm:$0xff] }
 0x127   :  { %v2965_v5 = vmax.f32 %v274_v27, 0.0  ;;  %v2967_v6 = vmax.f32 %v513_v29, 0.0  ;;  %v265_v7 = vmax.f32 %v253_v37, %v259_v28  ;;  %v508_v8 = vmax.f32 %v496_v38, %v502_v30  ;;  %792 = vmatmul.mubr.f32.gmra.mrb[28].mxu0 %v2939_v57  ;;  %1073 = vmatmul.mubr.f32.gmra.mrb[26].mxu1 %v2912_v45  ;;  %v244_v9 = vpop.f32.mrb[22].mxu0  ;;  %v487_v10 = vpop.f32.mrb[22].mxu1  ;;  %v619_v37 = vld [vmem:[%s3490_s1 + $0x3c8] sm:$0xff]  ;;  %v621_v38 = vld [vmem:[%s3490_s1 + $0x3d8] sm:$0xff] }
 0x128   :  { %1982 = vmatpush1.bf16.msra.mxu0 %v1981_v1  ;;  %2138 = vmatpush1.bf16.msra.mxu1 %v1977_v20  ;;  %v246_v11 = vpop.f32.mrb[23].mxu0  ;;  %v489_v12 = vpop.f32.mrb[23].mxu1  ;;  %v1989_v20 = vpack.c.bf16 %v616_v36, %v614_v34  ;;  %v1991_v46 = vpack.c.bf16 %v621_v38, %v619_v37  ;;  %v2003_v26 = vpack.c.bf16 %v633_v22, %v631_v25  ;;  %v641_v4 = vld [vmem:[%s3490_s1 + $0x478] sm:$0xff]  ;;  %v638_v28 = vld [vmem:[%s3490_s1 + $0x460] sm:$0xff]  ;;  %v640_v30 = vld [vmem:[%s3490_s1 + $0x470] sm:$0xff] }
 0x129   :  { %v275_v15 = vadd.f32 %v2882_v51, %v265_v7  ;;  %v260_v33 = vmax.f32 %v244_v9, %v246_v11  ;;  %v503_v35 = vmax.f32 %v487_v10, %v489_v12  ;;  %797 = vmatprep.mubr.f32.mxu0 %v2967_v6  ;;  %1984 = vmatprep.subr.bf16.mxu0 %v1983_v3  ;;  %v643_v31 = vld [vmem:[%s3490_s1 + $0x488] sm:$0xff]  ;;  %v645_v32 = vld [vmem:[%s3490_s1 + $0x498] sm:$0xff]  ;;  %v644_v9 = vld [vmem:[%s3490_s1 + $0x490] sm:$0xff] }
 0x12a   :  { %1078 = vmatprep.mubr.f32.mxu1 %v2965_v5  ;;  %2140 = vmatprep.subr.bf16.mxu1 %v1979_v54  ;;  %v2993_v16 = vadd.f32 %v2882_v51, %v508_v8  ;;  %v1997_v54 = vpack.c.bf16 %v624_v49, %v622_v48  ;;  %v2005_v62 = vpack.c.bf16 %v632_v59, %v630_v56  ;;  %v642_v8 = vld [vmem:[%s3490_s1 + $0x480] sm:$0xff]  ;;  %v647_v10 = vld [vmem:[%s3490_s1 + $0x4a8] sm:$0xff]  ;;  %v649_v11 = vld [vmem:[%s3490_s1 + $0x4b8] sm:$0xff] }
 0x12b   :  { %v2995_v17 = vmax.f32 %v275_v15, 0.0  ;;  %v266_v18 = vmax.f32 %v254_v43, %v260_v33  ;;  %v509_v19 = vmax.f32 %v497_v44, %v503_v35  ;;  %798 = vmatmul.mubr.f32.gmra.mrb[30].mxu0 %v2965_v5  ;;  %1079 = vmatmul.mubr.f32.gmra.mrb[28].mxu1 %v2941_v58  ;;  %v623_v43 = vld [vmem:[%s3490_s1 + $0x3e8] sm:$0xff]  ;;  %v625_v44 = vld [vmem:[%s3490_s1 + $0x3f8] sm:$0xff]  ;;  %v2007_v63 = vpack.c.bf16 %v637_v61, %v635_v60  ;;  %v648_v15 = vld [vmem:[%s3490_s1 + $0x4b0] sm:$0xff] }
 0x12c   :  { %1986 = vmatpush1.bf16.msra.mxu0 %v1985_v13  ;;  %2142 = vmatpush1.bf16.msra.mxu1 %v1981_v1  ;;  %v636_v1 = vld [vmem:[%s3490_s1 + $0x450] sm:$0xff]  ;;  %v2013_v2 = vpack.c.bf16 %v640_v30, %v638_v28  ;;  %v2015_v7 = vpack.c.bf16 %v645_v32, %v643_v31  ;;  %v2017_v12 = vpack.c.bf16 %v644_v9, %v642_v8  ;;  %v651_v33 = vld [vmem:[%s3490_s1 + $0x4c8] sm:$0xff]  ;;  %v653_v35 = vld [vmem:[%s3490_s1 + $0x4d8] sm:$0xff] }
 0x12d   :  { %868 = vmatprep.mubr.f32.mxu0 %v2912_v45  ;;  %1988 = vmatprep.subr.bf16.mxu0 %v1987_v14  ;;  %v3013_v41 = vadd.f32 %v2882_v51, %v266_v18  ;;  %v3016_v42 = vadd.f32 %v2882_v51, %v509_v19  ;;  %v1995_v51 = vpack.c.bf16 %v625_v44, %v623_v43  ;;  %v650_v37 = vld [vmem:[%s3490_s1 + $0x4c0] sm:$0xff]  ;;  %v652_v38 = vld [vmem:[%s3490_s1 + $0x4d0] sm:$0xff]  ;;  %v655_v18 = vld [vmem:[%s3490_s1 + $0x4e8] sm:$0xff] }
 0x12e   :  { %1084 = vmatprep.mubr.f32.mxu1 %v2995_v17  ;;  %2144 = vmatprep.subr.bf16.mxu1 %v1983_v3  ;;  %v639_v3 = vld [vmem:[%s3490_s1 + $0x468] sm:$0xff]  ;;  %v2009_v27 = vpack.c.bf16 %v636_v1, %v634_v0  ;;  %v2023_v36 = vpack.c.bf16 %v653_v35, %v651_v33  ;;  %v657_v19 = vld [vmem:[%s3490_s1 + $0x4f8] sm:$0xff]  ;;  %v658_v48 = vld [vmem:[%s3490_s1 + $0x500] sm:$0xff] }
 0x12f   :  { %1085 = vmatmul.mubr.f32.gmra.mrb[30].mxu1 %v2967_v6  ;;  %v2011_v29 = vpack.c.bf16 %v641_v4, %v639_v3  ;;  %v659_v43 = vld [vmem:[%s3490_s1 + $0x508] sm:$0xff]  ;;  %v661_v44 = vld [vmem:[%s3490_s1 + $0x518] sm:$0xff]  ;;  %v660_v49 = vld [vmem:[%s3490_s1 + $0x510] sm:$0xff]  ;;  %v282_v8 = vmax.f32 %v3013_v41, 0.0 }
 0x130   :  { %1990 = vmatpush1.bf16.msra.mxu0 %v1989_v20  ;;  %2146 = vmatpush1.bf16.msra.mxu1 %v1985_v13  ;;  %v2019_v13 = vpack.c.bf16 %v649_v11, %v647_v10  ;;  %v663_v52 = vld [vmem:[%s3490_s1 + $0x528] sm:$0xff]  ;;  %v665_v53 = vld [vmem:[%s3490_s1 + $0x538] sm:$0xff]  ;;  %v662_v21 = vld [vmem:[%s3490_s1 + $0x520] sm:$0xff]  ;;  %v2334_v11 = vmov 0.0  }
 0x131   :  { %1155 = vmatprep.mubr.f32.mxu1 %v2939_v57  ;;  %1992 = vmatprep.subr.bf16.mxu0 %v1991_v46  ;;  %v664_v23 = vld [vmem:[%s3490_s1 + $0x530] sm:$0xff]  ;;  %v667_v25 = vld [vmem:[%s3490_s1 + $0x548] sm:$0xff]  ;;  %v669_v22 = vld [vmem:[%s3490_s1 + $0x558] sm:$0xff] }
 0x132   :  { %2148 = vmatprep.subr.bf16.mxu1 %v1987_v14  ;;  %v646_v14 = vld [vmem:[%s3490_s1 + $0x4a0] sm:$0xff]  ;;  %v668_v59 = vld [vmem:[%s3490_s1 + $0x550] sm:$0xff]  ;;  %v671_v60 = vld [vmem:[%s3490_s1 + $0x568] sm:$0xff] }
 0x133   :  { %v2021_v34 = vpack.c.bf16 %v648_v15, %v646_v14  ;;  %v666_v56 = vld [vmem:[%s3490_s1 + $0x540] sm:$0xff]  ;;  %v673_v61 = vld [vmem:[%s3490_s1 + $0x578] sm:$0xff]  ;;  %v672_v0 = vld [vmem:[%s3490_s1 + $0x570] sm:$0xff] }
 0x134   :  { %1994 = vmatpush1.bf16.msra.mxu0 %v1993_v47  ;;  %2150 = vmatpush1.bf16.msra.mxu1 %v1989_v20  ;;  %v2025_v20 = vpack.c.bf16 %v652_v38, %v650_v37  ;;  %v675_v1 = vld [vmem:[%s3490_s1 + $0x588] sm:$0xff]  ;;  %v677_v3 = vld [vmem:[%s3490_s1 + $0x598] sm:$0xff]  ;;  %v674_v28 = vld [vmem:[%s3490_s1 + $0x580] sm:$0xff] }
 0x135   :  { %1996 = vmatprep.subr.bf16.mxu0 %v1995_v51  ;;  %2152 = vmatprep.subr.bf16.mxu1 %v1991_v46  ;;  %v2027_v46 = vpack.c.bf16 %v657_v19, %v655_v18  ;;  %v679_v30 = vld [vmem:[%s3490_s1 + $0x5a8] sm:$0xff]  ;;  %v685_v10 = vld [vmem:[%s3490_s1 + $0x5d8] sm:$0xff]  ;;  %v682_v14 = vld [vmem:[%s3490_s1 + $0x5c0] sm:$0xff] }
 0x136   :  { %v683_v9 = vld [vmem:[%s3490_s1 + $0x5c8] sm:$0xff]  ;;  %v684_v15 = vld [vmem:[%s3490_s1 + $0x5d0] sm:$0xff]  ;;  %v689_v35 = vld [vmem:[%s3490_s1 + $0x5f8] sm:$0xff] }
 0x137   :  { %v687_v33 = vld [vmem:[%s3490_s1 + $0x5e8] sm:$0xff]  ;;  %v686_v37 = vld [vmem:[%s3490_s1 + $0x5e0] sm:$0xff]  ;;  %v688_v38 = vld [vmem:[%s3490_s1 + $0x5f0] sm:$0xff] }
 0x138   :  { %1998 = vmatpush1.bf16.msra.mxu0 %v1997_v54  ;;  %2154 = vmatpush1.bf16.msra.mxu1 %v1993_v47  ;;  %v2029_v47 = vpack.c.bf16 %v656_v40, %v654_v39  ;;  %v691_v18 = vld [vmem:[%s3490_s1 + $0x608] sm:$0xff]  ;;  %v693_v19 = vld [vmem:[%s3490_s1 + $0x618] sm:$0xff]  ;;  %v690_v39 = vld [vmem:[%s3490_s1 + $0x600] sm:$0xff] }
 0x139   :  { %2000 = vmatprep.subr.bf16.mxu0 %v1999_v55  ;;  %2156 = vmatprep.subr.bf16.mxu1 %v1995_v51  ;;  %v2031_v51 = vpack.c.bf16 %v661_v44, %v659_v43  ;;  %v692_v40 = vld [vmem:[%s3490_s1 + $0x610] sm:$0xff]  ;;  %v1403_v44 = vld [vmem:[%s3490_s1 + $0x688] sm:$0xff] }
 0x13a   :  { %v2065_v43 = vpack.c.bf16 %v692_v40, %v690_v39  ;;  %v1296_v41 = vld [vmem:[%s3490_s1 + $0x630] sm:$0xff] }
 0x13c   :  { %2002 = vmatpush1.bf16.msra.mxu0 %v2001_v24  ;;  %2158 = vmatpush1.bf16.msra.mxu1 %v1997_v54  ;;  %v2033_v54 = vpack.c.bf16 %v660_v49, %v658_v48  ;;  %v1402_v48 = vld [vmem:[%s3490_s1 + $0x680] sm:$0xff]  ;;  %v1404_v49 = vld [vmem:[%s3490_s1 + $0x690] sm:$0xff] }
 0x13d   :  { %2004 = vmatprep.subr.bf16.mxu0 %v2003_v26  ;;  %2160 = vmatprep.subr.bf16.mxu1 %v1999_v55  ;;  %v2035_v55 = vpack.c.bf16 %v665_v53, %v663_v52  ;;  %v2241_v52 = vpack.c.bf16 %v1404_v49, %v1402_v48  ;;  %v1511_v48 = vld [vmem:[%s3492_s2 + $0x18] sm:$0xff] }
 0x140   :  { %2006 = vmatpush1.bf16.msra.mxu0 %v2005_v62  ;;  %2162 = vmatpush1.bf16.msra.mxu1 %v2001_v24  ;;  %v2037_v24 = vpack.c.bf16 %v664_v23, %v662_v21  ;;  %v1299_v21 = vld [vmem:[%s3490_s1 + $0x648] sm:$0xff]  ;;  %v1301_v23 = vld [vmem:[%s3490_s1 + $0x658] sm:$0xff] }
 0x141   :  { %2008 = vmatprep.subr.bf16.mxu0 %v2007_v63  ;;  %2164 = vmatprep.subr.bf16.mxu1 %v2003_v26  ;;  %v2039_v26 = vpack.c.bf16 %v669_v22, %v667_v25  ;;  %v1406_v25 = vld [vmem:[%s3490_s1 + $0x6a0] sm:$0xff]  ;;  %v1408_v22 = vld [vmem:[%s3490_s1 + $0x6b0] sm:$0xff] }
 0x144   :  { %2010 = vmatpush1.bf16.msra.mxu0 %v2009_v27  ;;  %2166 = vmatpush1.bf16.msra.mxu1 %v2005_v62  ;;  %v2041_v62 = vpack.c.bf16 %v668_v59, %v666_v56  ;;  %v2245_v56 = vpack.c.bf16 %v1408_v22, %v1406_v25  ;;  %v1300_v59 = vld [vmem:[%s3490_s1 + $0x650] sm:$0xff] }
 0x145   :  { %2012 = vmatprep.subr.bf16.mxu0 %v2011_v29  ;;  %2168 = vmatprep.subr.bf16.mxu1 %v2007_v63  ;;  %v2043_v63 = vpack.c.bf16 %v673_v61, %v671_v60  ;;  %v1411_v61 = vld [vmem:[%s3490_s1 + $0x6c8] sm:$0xff] }
 0x148   :  { %2014 = vmatpush1.bf16.msra.mxu0 %v2013_v2  ;;  %2170 = vmatpush1.bf16.msra.mxu1 %v2009_v27  ;;  %v3190_v27 = vmax.f32 %v2993_v16, 0.0  ;;  %v681_v16 = vld [vmem:[%s3490_s1 + $0x5b8] sm:$0xff] }
 0x149   :  { %2016 = vmatprep.subr.bf16.mxu0 %v2015_v7  ;;  %2172 = vmatprep.subr.bf16.mxu1 %v2011_v29  ;;  %v2047_v29 = vpack.c.bf16 %v677_v3, %v675_v1  ;;  %v2051_v32 = vpack.c.bf16 %v681_v16, %v679_v30  ;;  %v1412_v1 = vld [vmem:[%s3490_s1 + $0x6d0] sm:$0xff]  ;;  %v1305_v3 = vld [vmem:[%s3490_s1 + $0x678] sm:$0xff]  ;;  %v2335_v30 = vmov 0.0|0.0  }
 0x14c   :  { %2018 = vmatpush1.bf16.msra.mxu0 %v2017_v12  ;;  %2174 = vmatpush1.bf16.msra.mxu1 %v2013_v2  ;;  %v678_v2 = vld [vmem:[%s3490_s1 + $0x5a0] sm:$0xff] }
 0x14d   :  { %2020 = vmatprep.subr.bf16.mxu0 %v2019_v13  ;;  %2176 = vmatprep.subr.bf16.mxu1 %v2015_v7  ;;  %v680_v7 = vld [vmem:[%s3490_s1 + $0x5b0] sm:$0xff] }
 0x150   :  { %2022 = vmatpush1.bf16.msra.mxu0 %v2021_v34  ;;  %2178 = vmatpush1.bf16.msra.mxu1 %v2017_v12  ;;  %v2053_v12 = vpack.c.bf16 %v680_v7, %v678_v2 }
 0x151   :  { %2024 = vmatprep.subr.bf16.mxu0 %v2023_v36  ;;  %2180 = vmatprep.subr.bf16.mxu1 %v2019_v13  ;;  %v2055_v13 = vpack.c.bf16 %v685_v10, %v683_v9 }
 0x154   :  { %2026 = vmatpush1.bf16.msra.mxu0 %v2025_v20  ;;  %2182 = vmatpush1.bf16.msra.mxu1 %v2021_v34  ;;  %v2057_v34 = vpack.c.bf16 %v684_v15, %v682_v14 }
 0x155   :  { %2028 = vmatprep.subr.bf16.mxu0 %v2027_v46  ;;  %2184 = vmatprep.subr.bf16.mxu1 %v2023_v36  ;;  %v2059_v36 = vpack.c.bf16 %v689_v35, %v687_v33 }
 0x158   :  { %2030 = vmatpush1.bf16.msra.mxu0 %v2029_v47  ;;  %2186 = vmatpush1.bf16.msra.mxu1 %v2025_v20  ;;  %v2061_v20 = vpack.c.bf16 %v688_v38, %v686_v37  ;;  %v1509_v37 = vld [vmem:[%s3492_s2 + $0x8] sm:$0xff] }
 0x159   :  { %2032 = vmatprep.subr.bf16.mxu0 %v2031_v51  ;;  %2188 = vmatprep.subr.bf16.mxu1 %v2027_v46  ;;  %v2063_v46 = vpack.c.bf16 %v693_v19, %v691_v18 }
 0x15c   :  { %2034 = vmatpush1.bf16.msra.mxu0 %v2033_v54  ;;  %2190 = vmatpush1.bf16.msra.mxu1 %v2029_v47  ;;  %v1405_v47 = vld [vmem:[%s3490_s1 + $0x698] sm:$0xff] }
 0x15d   :  { %2036 = vmatprep.subr.bf16.mxu0 %v2035_v55  ;;  %2192 = vmatprep.subr.bf16.mxu1 %v2031_v51  ;;  %v2239_v51 = vpack.c.bf16 %v1405_v47, %v1403_v44 }
 0x15f   :  { %869 = vmatmul.mubr.f32.vlgmr.msra.gmra.mrb[24].mxu0 %v2920_v50  ;;  %v670_v50 = vld [vmem:[%s3490_s1 + $0x560] sm:$0xff] }
 0x160   :  { %874 = vmatprep.mubr.f32.mxu0 %v2941_v58  ;;  %2038 = vmatpush1.bf16.msra.mxu0 %v2037_v24  ;;  %v2045_v4 = vpack.c.bf16 %v672_v0, %v670_v50  ;;  %v1410_v0 = vld [vmem:[%s3490_s1 + $0x6c0] sm:$0xff] }
 0x161   :  { %2194 = vmatpush1.bf16.msra.mxu1 %v2033_v54  ;;  %2040 = vmatprep.subr.bf16.mxu0 %v2039_v26  ;;  %v1409_v54 = vld [vmem:[%s3490_s1 + $0x6b8] sm:$0xff] }
 0x162   :  { %2196 = vmatprep.subr.bf16.mxu1 %v2035_v55 }
 0x163   :  { %875 = vmatmul.mubr.f32.gmra.mrb[26].mxu0 %v2939_v57 }
 0x164   :  { %1156 = vmatmul.mubr.f32.vlgmr.msra.gmra.mrb[24].mxu1 %v2912_v45  ;;  %880 = vmatprep.mubr.f32.mxu0 %v2967_v6  ;;  %v676_v45 = vld [vmem:[%s3490_s1 + $0x590] sm:$0xff] }
 0x165   :  { %2042 = vmatpush1.bf16.msra.mxu0 %v2041_v62  ;;  %1161 = vmatprep.mubr.f32.mxu1 %v2965_v5  ;;  %v2049_v31 = vpack.c.bf16 %v676_v45, %v674_v28  ;;  %v1304_v28 = vld [vmem:[%s3490_s1 + $0x670] sm:$0xff] }
 0x166   :  { %2198 = vmatpush1.bf16.msra.mxu1 %v2037_v24  ;;  %2044 = vmatprep.subr.bf16.mxu0 %v2043_v63  ;;  %v2231_v24 = vpack.c.bf16 %v1301_v23, %v1299_v21 }
 0x167   :  { %881 = vmatmul.mubr.f32.gmra.mrb[28].mxu0 %v2965_v5  ;;  %2200 = vmatprep.subr.bf16.mxu1 %v2039_v26  ;;  %v1298_v26 = vld [vmem:[%s3490_s1 + $0x640] sm:$0xff] }
 0x168   :  { %1162 = vmatmul.mubr.f32.gmra.mrb[26].mxu1 %v2941_v58  ;;  %886 = vmatprep.mubr.f32.mxu0 %v3190_v27  ;;  %v2233_v60 = vpack.c.bf16 %v1300_v59, %v1298_v26  ;;  %v1514_v26 = vld [vmem:[%s3492_s2 + $0x30] sm:$0xff] }
 0x169   :  { %2046 = vmatpush1.bf16.msra.mxu0 %v2045_v4  ;;  %1167 = vmatprep.mubr.f32.mxu1 %v2995_v17 }
 0x16a   :  { %2202 = vmatpush1.bf16.msra.mxu1 %v2041_v62  ;;  %2048 = vmatprep.subr.bf16.mxu0 %v2047_v29  ;;  %v1413_v62 = vld [vmem:[%s3490_s1 + $0x6d8] sm:$0xff] }
 0x16b   :  { %887 = vmatmul.mubr.f32.gmra.mrb[30].mxu0 %v2995_v17  ;;  %2204 = vmatprep.subr.bf16.mxu1 %v2043_v63  ;;  %v1303_v63 = vld [vmem:[%s3490_s1 + $0x668] sm:$0xff]  ;;  %v2247_v50 = vpack.c.bf16 %v1413_v62, %v1411_v61 }
 0x16c   :  { %1168 = vmatmul.mubr.f32.gmra.mrb[28].mxu1 %v2967_v6  ;;  %957 = vmatprep.mubr.f32.mxu0 %v2334_v11  ;;  %v1517_v61 = vld [vmem:[%s3492_s2 + $0x48] sm:$0xff] }
 0x16d   :  { %2050 = vmatpush1.bf16.msra.mxu0 %v2049_v31  ;;  %1173 = vmatprep.mubr.f32.mxu1 %v282_v8 }
 0x16e   :  { %2206 = vmatpush1.bf16.msra.mxu1 %v2045_v4  ;;  %2052 = vmatprep.subr.bf16.mxu0 %v2051_v32  ;;  %v2249_v4 = vpack.c.bf16 %v1412_v1, %v1410_v0  ;;  %v1520_v1 = vld [vmem:[%s3492_s2 + $0x60] sm:$0xff] }
 0x16f   :  { %2208 = vmatprep.subr.bf16.mxu1 %v2047_v29  ;;  %v1302_v29 = vld [vmem:[%s3490_s1 + $0x660] sm:$0xff] }
 0x170   :  { %1174 = vmatmul.mubr.f32.gmra.mrb[30].mxu1 %v3190_v27  ;;  %v2237_v45 = vpack.c.bf16 %v1304_v28, %v1302_v29  ;;  %v1523_v29 = vld [vmem:[%s3492_s2 + $0x78] sm:$0xff] }
 0x171   :  { %2054 = vmatpush1.bf16.msra.mxu0 %v2053_v12  ;;  %1244 = vmatprep.mubr.f32.mxu1 %v2334_v11 }
 0x172   :  { %2210 = vmatpush1.bf16.msra.mxu1 %v2049_v31  ;;  %2056 = vmatprep.subr.bf16.mxu0 %v2055_v13 }
 0x173   :  { %2212 = vmatprep.subr.bf16.mxu1 %v2051_v32 }
 0x175   :  { %2058 = vmatpush1.bf16.msra.mxu0 %v2057_v34 }
 0x176   :  { %2214 = vmatpush1.bf16.msra.mxu1 %v2053_v12  ;;  %2060 = vmatprep.subr.bf16.mxu0 %v2059_v36  ;;  %v1719_v12 = vld [vmem:[%s3492_s2 + $0x108] ss:$0 sm:$0xff] }
 0x177   :  { %2216 = vmatprep.subr.bf16.mxu1 %v2055_v13 }
 0x179   :  { %2062 = vmatpush1.bf16.msra.mxu0 %v2061_v20 }
 0x17a   :  { %2218 = vmatpush1.bf16.msra.mxu1 %v2057_v34  ;;  %2064 = vmatprep.subr.bf16.mxu0 %v2063_v46 }
 0x17b   :  { %2220 = vmatprep.subr.bf16.mxu1 %v2059_v36  ;;  %v1508_v36 = vld [vmem:[%s3492_s2] sm:$0xff] }
 0x17d   :  { %2066 = vmatpush1.bf16.msra.mxu0 %v2065_v43 }
 0x17e   :  { %2222 = vmatpush1.bf16.msra.mxu1 %v2061_v20 }
 0x17f   :  { %2224 = vmatprep.subr.bf16.mxu1 %v2063_v46 }
 0x180   :  { %958 = vmatmul.mubr.f32.vlgmr.msra.gmra.mrb[24].mxu0 %v2939_v57  ;;  %v521_v57 = vmax.f32 %v3016_v42, 0.0  ;;  %v1407_v42 = vld [vmem:[%s3490_s1 + $0x6a8] sm:$0xff] }
 0x181   :  { %963 = vmatprep.mubr.f32.mxu0 %v2334_v11  ;;  %v2243_v55 = vpack.c.bf16 %v1409_v54, %v1407_v42  ;;  %v1512_v42 = vld [vmem:[%s3492_s2 + $0x20] sm:$0xff] }
 0x182   :  { %2226 = vmatpush1.bf16.msra.mxu1 %v2065_v43  ;;  %v2252_v43 = vpack.c.bf16 %v1509_v37, %v1508_v36  ;;  %v1611_v37 = vld [vmem:[%s3492_s2 + $0xe0] sm:$0xff] }
 0x183   :  { %2240 = vmatprep.subr.bf16.mxu1 %v2239_v51  ;;  %v1510_v51 = vld [vmem:[%s3492_s2 + $0x10] sm:$0xff] }
 0x184   :  { %964 = vmatmul.mubr.f32.gmra.mrb[26].mxu0 %v2965_v5  ;;  %v1297_v5 = vld [vmem:[%s3490_s1 + $0x638] sm:$0xff] }
 0x185   :  { %1245 = vmatmul.mubr.f32.vlgmr.msra.gmra.mrb[24].mxu1 %v2941_v58  ;;  %969 = vmatprep.mubr.f32.mxu0 %v2334_v11  ;;  %v1295_v58 = vld [vmem:[%s3490_s1 + $0x628] sm:$0xff] }
 0x186   :  { %1250 = vmatprep.mubr.f32.mxu1 %v2334_v11  ;;  %2242 = vmatpush1.bf16.msra.mxu1 %v2241_v52 }
 0x187   :  { %2244 = vmatprep.subr.bf16.mxu1 %v2243_v55 }
 0x188   :  { %970 = vmatmul.mubr.f32.gmra.mrb[28].mxu0 %v2995_v17  ;;  %v1294_v17 = vld [vmem:[%s3490_s1 + $0x620] sm:$0xff] }
 0x189   :  { %1251 = vmatmul.mubr.f32.gmra.mrb[26].mxu1 %v2967_v6  ;;  %975 = vmatprep.mubr.f32.mxu0 %v2334_v11  ;;  %v2227_v6 = vpack.c.bf16 %v1297_v5, %v1295_v58  ;;  %v2229_v53 = vpack.c.bf16 %v1296_v41, %v1294_v17 }
 0x18a   :  { %1256 = vmatprep.mubr.f32.mxu1 %v2334_v11  ;;  %2246 = vmatpush1.bf16.msra.mxu1 %v2245_v56  ;;  %v1515_v56 = vld [vmem:[%s3492_s2 + $0x38] sm:$0xff] }
 0x18b   :  { %2228 = vmatprep.subr.bf16.mxu0 %v2227_v6  ;;  %2248 = vmatprep.subr.bf16.mxu1 %v2247_v50  ;;  %v2255_v6 = vpack.c.bf16 %v1511_v48, %v1510_v51  ;;  %v2261_v59 = vpack.c.bf16 %v1515_v56, %v1514_v26  ;;  %v1519_v50 = vld [vmem:[%s3492_s2 + $0x58] sm:$0xff] }
 0x18c   :  { %976 = vmatmul.mubr.f32.gmra.mrb[30].mxu0 %v282_v8 }
 0x18d   :  { %1257 = vmatmul.mubr.f32.gmra.mrb[28].mxu1 %v3190_v27  ;;  %1383 = vmatprep.mubr.f32.mxu0 %v2334_v11  ;;  %v2235_v27 = vpack.c.bf16 %v1305_v3, %v1303_v63  ;;  %v1518_v63 = vld [vmem:[%s3492_s2 + $0x50] sm:$0xff]  ;;  %v1521_v3 = vld [vmem:[%s3492_s2 + $0x68] sm:$0xff] }
 0x18e   :  { %1262 = vmatprep.mubr.f32.mxu1 %v2334_v11  ;;  %2230 = vmatpush1.bf16.msra.mxu0 %v2229_v53  ;;  %v1513_v53 = vld [vmem:[%s3492_s2 + $0x28] sm:$0xff]  ;;  %v2267_v0 = vpack.c.bf16 %v1519_v50, %v1518_v63 }
 0x18f   :  { %2232 = vmatprep.subr.bf16.mxu0 %v2231_v24  ;;  %2250 = vmatpush1.bf16.msra.mxu1 %v2249_v4  ;;  %v2258_v25 = vpack.c.bf16 %v1513_v53, %v1512_v42  ;;  %v2270_v4 = vpack.c.bf16 %v1521_v3, %v1520_v1 }
 0x190   :  { %2275 = vmatprep.subr.bf16.mxu1 %v2335_v30 }
 0x191   :  { %1263 = vmatmul.mubr.f32.gmra.mrb[30].mxu1 %v521_v57 }
 0x192   :  { %1478 = vmatprep.mubr.f32.mxu1 %v2334_v11  ;;  %2234 = vmatpush1.bf16.msra.mxu0 %v2233_v60  ;;  %v1516_v60 = vld [vmem:[%s3492_s2 + $0x40] sm:$0xff] }
 0x193   :  { %2236 = vmatprep.subr.bf16.mxu0 %v2235_v27  ;;  %v2264_v62 = vpack.c.bf16 %v1517_v61, %v1516_v60  ;;  %v1522_v27 = vld [vmem:[%s3492_s2 + $0x70] sm:$0xff] }
 0x194   :  { %v2273_v28 = vpack.c.bf16 %v1523_v29, %v1522_v27 }
 0x196   :  { %2238 = vmatpush1.bf16.msra.mxu0 %v2237_v45  ;;  %v1599_v45 = vld [vmem:[%s3492_s2 + $0x80] sm:$0xff] }
 0x197   :  { %2251 = vmatprep.subr.bf16.mxu0 %v2335_v30 }
 0x253   :  { %v959_v16 = vpop.f32.mrb[24].mxu0 }
 0x254   :  { %v961_v31 = vpop.f32.mrb[25].mxu0 }
 0x257   :  { %v965_v32 = vpop.f32.mrb[26].mxu0 }
 0x258   :  { %v1246_v2 = vpop.f32.mrb[24].mxu1  ;;  %v967_v7 = vpop.f32.mrb[27].mxu0 }
 0x259   :  { %v1269_v8 = vmax.f32 %v959_v16, %v1246_v2  ;;  %v1248_v9 = vpop.f32.mrb[25].mxu1  ;;  %v1600_v16 = vld [vmem:[%s3492_s2 + $0x88] sm:$0xff]  ;;  %v1602_v2 = vld [vmem:[%s3492_s2 + $0x98] sm:$0xff] }
 0x25a   :  { %v1270_v10 = vmax.f32 %v961_v31, %v1248_v9  ;;  %v1601_v31 = vld [vmem:[%s3492_s2 + $0x90] sm:$0xff] }
 0x25b   :  { %v971_v13 = vpop.f32.mrb[28].mxu0 }
 0x25c   :  { %v1277_v14 = vmax.f32 %v1269_v8, %v1270_v10  ;;  %v1252_v15 = vpop.f32.mrb[26].mxu1  ;;  %v973_v33 = vpop.f32.mrb[29].mxu0  ;;  %v1604_v8 = vld [vmem:[%s3492_s2 + $0xa8] sm:$0xff]  ;;  %v1605_v10 = vld [vmem:[%s3492_s2 + $0xb0] sm:$0xff] }
 0x25d   :  { %v1271_v35 = vmax.f32 %v965_v32, %v1252_v15  ;;  %v1254_v34 = vpop.f32.mrb[27].mxu1  ;;  %v2276_v32 = vpack.c.bf16 %v1600_v16, %v1599_v45  ;;  %v1608_v15 = vld [vmem:[%s3492_s2 + $0xc8] sm:$0xff] }
 0x25e   :  { %v1285_v38 = vadd.f32 %v1719_v12, %v1277_v14  ;;  %v1272_v18 = vmax.f32 %v967_v7, %v1254_v34  ;;  %v2279_v7 = vpack.c.bf16 %v1602_v2, %v1601_v31  ;;  %v1607_v14 = vld [vmem:[%s3492_s2 + $0xc0] sm:$0xff]  ;;  %v1610_v34 = vld [vmem:[%s3492_s2 + $0xd8] sm:$0xff] }
 0x25f   :  { %v977_v19 = vpop.f32.mrb[30].mxu0 }
 0x260   :  { %v1289_v20 = vmax.f32 %v1285_v38, 0.0  ;;  %v1278_v46 = vmax.f32 %v1271_v35, %v1272_v18  ;;  %v1258_v39 = vpop.f32.mrb[28].mxu1  ;;  %v979_v40 = vpop.f32.mrb[31].mxu0  ;;  %v1609_v35 = vld [vmem:[%s3492_s2 + $0xd0] sm:$0xff]  ;;  %v1612_v38 = vld [vmem:[%s3492_s2 + $0xe8] sm:$0xff] }
 0x261   :  { %v1273_v44 = vmax.f32 %v971_v13, %v1258_v39  ;;  %v1260_v47 = vpop.f32.mrb[29].mxu1  ;;  %v2291_v36 = vpack.c.bf16 %v1610_v34, %v1609_v35  ;;  %v2294_v18 = vpack.c.bf16 %v1612_v38, %v1611_v37 }
 0x262   :  { %v1286_v49 = vadd.f32 %v1719_v12, %v1278_v46  ;;  %v1274_v52 = vmax.f32 %v973_v33, %v1260_v47  ;;  %1720 = vmatmul.mubr.msk.f32.vlgmr.msra.gmra.mrb[32].mxu0 %vm1306_vm1, %v1289_v20  ;;  %1724 = vmatmul.mubr.msk.f32.vlgmr.msra.gmra.mrb[32].mxu1 %vm1306_vm1, %v1289_v20  ;;  %v2288_v33 = vpack.c.bf16 %v1608_v15, %v1607_v14 }
 0x263   :  { %1388 = vmatprep.mubr.f32.mxu0 %v2334_v11  ;;  %1482 = vmatprep.mubr.f32.mxu1 %v2334_v11 }
 0x264   :  { %v1290_v57 = vmax.f32 %v1286_v49, 0.0  ;;  %v1279_v58 = vmax.f32 %v1273_v44, %v1274_v52  ;;  %v1264_v5 = vpop.f32.mrb[30].mxu1  ;;  %2253 = vmatpush3.bf16.msra.mxu0 %v2252_v43  ;;  %2277 = vmatpush3.bf16.msra.mxu1 %v2276_v32 }
 0x265   :  { %v1275_v17 = vmax.f32 %v977_v19, %v1264_v5  ;;  %v1266_v41 = vpop.f32.mrb[31].mxu1  ;;  %2254 = vmatprep.subr.bf16.mxu0 %v2335_v30  ;;  %2278 = vmatprep.subr.bf16.mxu1 %v2335_v30 }
 0x266   :  { %v1287_v54 = vadd.f32 %v1719_v12, %v1279_v58  ;;  %v1276_v55 = vmax.f32 %v979_v40, %v1266_v41  ;;  %1721 = vmatmul.mubr.msk.f32.gmra.mrb[34].mxu0 %vm1306_vm1, %v1290_v57  ;;  %1725 = vmatmul.mubr.msk.f32.gmra.mrb[34].mxu1 %vm1306_vm1, %v1290_v57 }
 0x267   :  { %1393 = vmatprep.mubr.f32.mxu0 %v2334_v11  ;;  %1486 = vmatprep.mubr.f32.mxu1 %v2334_v11 }
 0x268   :  { %v1291_v21 = vmax.f32 %v1287_v54, 0.0  ;;  %v1280_v23 = vmax.f32 %v1275_v17, %v1276_v55  ;;  %2256 = vmatpush3.bf16.msra.mxu0 %v2255_v6  ;;  %2280 = vmatpush3.bf16.msra.mxu1 %v2279_v7  ;;  %v1613_v55 = vld [vmem:[%s3492_s2 + $0xf0] sm:$0xff] }
 0x269   :  { %2257 = vmatprep.subr.bf16.mxu0 %v2335_v30  ;;  %2281 = vmatprep.subr.bf16.mxu1 %v2335_v30 }
 0x26a   :  { %v1288_v22 = vadd.f32 %v1719_v12, %v1280_v23  ;;  %1722 = vmatmul.mubr.msk.f32.gmra.mrb[36].mxu0 %vm1306_vm1, %v1291_v21  ;;  %1726 = vmatmul.mubr.msk.f32.gmra.mrb[36].mxu1 %vm1306_vm1, %v1291_v21  ;;  %v1606_v12 = vld [vmem:[%s3492_s2 + $0xb8] sm:$0xff] }
 0x26b   :  { %1397 = vmatprep.mubr.f32.mxu0 %v2334_v11  ;;  %1491 = vmatprep.mubr.f32.mxu1 %v2334_v11  ;;  %v2285_v13 = vpack.c.bf16 %v1606_v12, %v1605_v10  ;;  %v1614_v21 = vld [vmem:[%s3492_s2 + $0xf8] sm:$0xff] }
 0x26c   :  { %v1292_v24 = vmax.f32 %v1288_v22, 0.0  ;;  %2259 = vmatpush3.bf16.msra.mxu0 %v2258_v25  ;;  %v2297_v23 = vpack.c.bf16 %v1614_v21, %v1613_v55  ;;  %v1729_v25 = vld [vmem:[%s3492_s2 + $0x118] ss:$0 sm:$0xff] }
 0x26d   :  { %2260 = vmatprep.subr.bf16.mxu0 %v2335_v30 }
 0x26e   :  { %1723 = vmatmul.mubr.msk.f32.gmra.mrb[38].mxu0 %vm1306_vm1, %v1292_v24  ;;  %1727 = vmatmul.mubr.msk.f32.gmra.mrb[38].mxu1 %vm1306_vm1, %v1292_v24 }
 0x26f   :  { %1797 = vmatprep.mubr.msk.f32.mxu0 %vm2336_vm2, %v2334_v11  ;;  %1832 = vmatprep.mubr.msk.f32.mxu1 %vm2336_vm2, %v2334_v11  ;;  %v1603_v11 = vld [vmem:[%s3492_s2 + $0xa0] sm:$0xff] }
 0x270   :  { %2262 = vmatpush3.bf16.msra.mxu0 %v2261_v59  ;;  %v2282_v9 = vpack.c.bf16 %v1604_v8, %v1603_v11  ;;  %v1730_v59 = vld [vmem:[%s3492_s2 + $0x120] ss:$0 sm:$0xff] }
 0x271   :  { %2263 = vmatprep.subr.bf16.mxu0 %v2335_v30 }
 0x272   :  { %2283 = vmatpush3.bf16.msra.mxu1 %v2282_v9 }
 0x273   :  { %2284 = vmatprep.subr.bf16.mxu1 %v2335_v30 }
 0x274   :  { %2265 = vmatpush3.bf16.msra.mxu0 %v2264_v62 }
 0x275   :  { %2266 = vmatprep.subr.bf16.mxu0 %v2335_v30 }
 0x276   :  { %2286 = vmatpush3.bf16.msra.mxu1 %v2285_v13 }
 0x277   :  { %2287 = vmatprep.subr.bf16.mxu1 %v2335_v30 }
 0x278   :  { %2268 = vmatpush3.bf16.msra.mxu0 %v2267_v0 }
 0x279   :  { %2269 = vmatprep.subr.bf16.mxu0 %v2335_v30 }
 0x27a   :  { %2289 = vmatpush3.bf16.msra.mxu1 %v2288_v33 }
 0x27b   :  { %2290 = vmatprep.subr.bf16.mxu1 %v2335_v30 }
 0x27c   :  { %2271 = vmatpush3.bf16.msra.mxu0 %v2270_v4 }
 0x27d   :  { %2272 = vmatprep.subr.bf16.mxu0 %v2335_v30 }
 0x27e   :  { %2292 = vmatpush3.bf16.msra.mxu1 %v2291_v36 }
 0x27f   :  { %2293 = vmatprep.subr.bf16.mxu1 %v2335_v30 }
 0x280   :  { %2274 = vmatpush3.bf16.msra.mxu0 %v2273_v28 }
 0x282   :  { %2295 = vmatpush3.bf16.msra.mxu1 %v2294_v18 }
 0x283   :  { %2296 = vmatprep.subr.bf16.mxu1 %v2335_v30  ;;  %v1728_v30 = vld [vmem:[%s3492_s2 + $0x110] ss:$0 sm:$0xff] }
 0x286   :  { %2298 = vmatpush3.bf16.msra.mxu1 %v2297_v23 }
 0x335   :  { %v1385_v19 = vpop.f32.mrb[32].mxu0  ;;  %v1480_v20 = vpop.f32.mrb[32].mxu1 }
 0x336   :  { %v1387_v46 = vpop.f32.mrb[33].mxu0  ;;  %v1481_v39 = vpop.f32.mrb[33].mxu1 }
 0x339   :  { %v1390_v40 = vpop.f32.mrb[34].mxu0  ;;  %v1484_v43 = vpop.f32.mrb[34].mxu1 }
 0x33a   :  { %v1391_v44 = vpop.f32.mrb[35].mxu0  ;;  %v1485_v47 = vpop.f32.mrb[35].mxu1 }
 0x33b   :  { %v1497_v51 = vadd.f32 %v1391_v44, %v1385_v19 }
 0x33d   :  { %v1395_v48 = vpop.f32.mrb[36].mxu0  ;;  %v1488_v49 = vpop.f32.mrb[36].mxu1 }
 0x33e   :  { %v1498_v52 = vadd.f32 %v1497_v51, %v1488_v49  ;;  %v1396_v57 = vpop.f32.mrb[37].mxu0  ;;  %v1490_v58 = vpop.f32.mrb[37].mxu1 }
 0x341   :  { %v1399_v5 = vpop.f32.mrb[38].mxu0  ;;  %v1493_v6 = vpop.f32.mrb[38].mxu1 }
 0x342   :  { %v1400_v17 = vpop.f32.mrb[39].mxu0  ;;  %v1494_v41 = vpop.f32.mrb[39].mxu1 }
 0x343   :  { %v1499_v42 = vadd.f32 %v1498_v52, %v1494_v41 }
 0x345   :  { %v1504_v53 = vadd.f32 %v1728_v30, %v1499_v42 }
 0x347   :  { %v1505_v54 = vmax.f32 %v1504_v53, 0.0 }
 0x349   :  { %1798 = vmatmul.mubr.f32.vlgmr.msra.gmra.mrb[40].mxu0 %v1505_v54 }
 0x41c   :  { %v1594_v22 = vpop.f32.mrb[40].mxu0 }
 0x41d   :  { %v1595_v24 = vadd.f32 %v1729_v25, %v1594_v22  ;;  %v1799_v26 = vpop.f32.mrb[41].mxu0 }
 0x41f   :  { %v1598_v56 = vmax.f32 %v1595_v24, 0.0 }
 0x421   :  { %1833 = vmatmul.mubr.f32.vlgmr.msra.gmra.mrb[40].mxu1 %v1598_v56 }
 0x4f4   :  { %v1685_v60 = vpop.f32.mrb[40].mxu1 }
 0x4f5   :  { %v1686_v61 = vadd.f32 %v1730_v59, %v1685_v60  ;;  %v1834_v62 = vpop.f32.mrb[41].mxu1 }
 0x4f7   :  { %1689 = vst [vmem:[%s3493_s3] sm:$0xff] %v1686_v61 }

</bundles_post_ra>
